<compile_context>
chip_gen: v7x
topology: tpu7x:2x2x1
jax: 0.10.0
libtpu: 0.0.40
codegen_flags: <defaults>
</compile_context>

<pallas_src>
import functools

import jax
import jax.numpy as jnp
import numpy as np
from jax.experimental import pallas as pl
from jax.experimental.pallas import tpu as pltpu


# ---------------------------------------------------------------------------
# Device-aware configuration helpers
# ---------------------------------------------------------------------------
def _device_info():
    kind = ""
    try:
        kind = jax.devices()[0].device_kind.lower()
    except Exception:
        pass
    vmem = None
    try:
        vmem = int(pltpu.get_tpu_info().vmem_capacity_bytes)
    except Exception:
        vmem = None
    if vmem is None:
        vmem = (64 << 20) if "v7" in kind else (128 << 20)
    return kind, vmem


def _pad_lane(n):
    return ((n + 127) // 128) * 128


def _layer_vmem_estimate(S, Sq, E, dff, H):
    """Rough per-grid-step VMEM working set (bytes), lane-padding aware."""
    bf, f32 = 2, 4
    Dh = E // H
    weights = (4 * E * E + 2 * E * dff) * bf
    small = (16 * _pad_lane(E) + _pad_lane(dff)) * f32
    io = (2 * S + Sq) * _pad_lane(E) * bf                     # x, pos, out blocks
    scratch = 2 * H * S * _pad_lane(Dh) * bf                  # cached K/V heads
    work = (H * Sq * _pad_lane(S) * (f32 + bf)                # scores f32 + probs bf16
            + 2 * S * _pad_lane(E) * f32                      # K/V f32 temporaries (qi==0)
            + Sq * _pad_lane(dff) * f32                       # FFN hidden
            + 8 * Sq * _pad_lane(E) * f32                     # q/attn/y/z temporaries
            + 2 * H * Sq * _pad_lane(Dh) * (f32 + bf))        # q heads + ctx
    total = 2 * (weights + small + io) + scratch + work       # x2: double-buffered blocks
    return int(total * 1.25) + (2 << 20)                      # compiler-scratch headroom


def _pick_q_block(S, E, dff, H, budget, max_block):
    cands = ([S] if S <= max_block else [])
    cands += [c for c in (512, 384, 256, 128, 64, 32, 16, 8)
              if c <= max_block and c < S and S % c == 0]
    for c in cands:
        if _layer_vmem_estimate(S, c, E, dff, H) <= budget:
            return c
    # No candidate fits (or S has no multiple-of-8 divisor <= max_block):
    # fall back to the smallest legal tile; vmem_limit is clamped to budget anyway.
    return cands[-1] if cands else S


# ---------------------------------------------------------------------------
# Kernel: one TransformerEncoderLayer.forward_post step for one (batch, q-tile)
# ---------------------------------------------------------------------------
def _encoder_layer_kernel(x_ref, pos_ref,
                          wq_ref, wk_ref, wv_ref, wo_ref, w1_ref, w2_ref,
                          vecs_ref, b1_ref,
                          o_ref,
                          k_sc, v_sc,
                          *, nhead, q_block, eps, exp_bf16):
    S = x_ref.shape[1]
    E = x_ref.shape[2]
    H = nhead
    Dh = E // H
    Sq = q_block
    bf16 = jnp.bfloat16
    f32 = jnp.float32

    qi = pl.program_id(1)

    # Packed per-layer vectors (9, E) f32:
    #   0 bq (scale folded), 1 bk, 2 bv, 3 bo, 4 b2, 5 g1, 6 be1, 7 g2, 8 be2
    vecs = vecs_ref[...]
    bq, bk, bv = vecs[0:1], vecs[1:2], vecs[2:3]
    bo, b2 = vecs[3:4], vecs[4:5]
    g1, be1 = vecs[5:6], vecs[6:7]
    g2, be2 = vecs[7:8], vecs[8:9]

    x_full = x_ref[0]                               # (S, E) bf16 (resident over q)
    pos_full = pos_ref[0]                           # (S, E) bf16

    # ---- K/V projection: computed ONCE per batch item, cached in VMEM scratch ----
    @pl.when(qi == 0)
    def _():
        qk_full = x_full + pos_full                 # with_pos_embed (K path), bf16
        k = jnp.dot(qk_full, wk_ref[...], preferred_element_type=f32) + bk   # (S, E) f32
        v = jnp.dot(x_full, wv_ref[...], preferred_element_type=f32) + bv    # (S, E) f32
        # Relayout to head-major once per batch; reused by every q tile.
        k_sc[...] = jnp.transpose(k.astype(bf16).reshape(S, H, Dh), (1, 0, 2))
        v_sc[...] = jnp.transpose(v.astype(bf16).reshape(S, H, Dh), (1, 0, 2))

    # ---- query tile ----
    q_start = pl.multiple_of(qi * Sq, Sq)
    x_q = x_ref[0, pl.ds(q_start, Sq), :]                    # (Sq, E) bf16 residual rows
    qk_q = x_q + pos_ref[0, pl.ds(q_start, Sq), :]           # with_pos_embed (Q path)

    q = jnp.dot(qk_q, wq_ref[...], preferred_element_type=f32) + bq       # (Sq, E) f32
    q3 = jnp.transpose(q.astype(bf16).reshape(Sq, H, Dh), (1, 0, 2))      # (H, Sq, Dh)

    # ---- head-batched attention against the cached K/V (no masks, eval dropout) ----
    s = jnp.einsum('hqd,hkd->hqk', q3, k_sc[...],
                   preferred_element_type=f32)                            # (H, Sq, S)
    s = s - jnp.max(s, axis=-1, keepdims=True)
    if exp_bf16:
        p = jnp.exp(s.astype(bf16)).astype(f32)     # bf16 EUP path (v6e/v7x only)
    else:
        p = jnp.exp(s)
    p = p * pl.reciprocal(jnp.sum(p, axis=-1, keepdims=True), approx=True)

    ctx = jnp.einsum('hqk,hkd->hqd', p.astype(bf16), v_sc[...],
                     preferred_element_type=f32)                          # (H, Sq, Dh)
    attn = jnp.transpose(ctx, (1, 0, 2)).reshape(Sq, E)                   # (Sq, E)

    attn = jnp.dot(attn.astype(bf16), wo_ref[...], preferred_element_type=f32) + bo

    # ---- residual + LayerNorm1 (dropout1 == identity in eval) ----
    y = x_q.astype(f32) + attn
    mu = jnp.mean(y, axis=-1, keepdims=True)
    var = jnp.mean((y - mu) ** 2, axis=-1, keepdims=True)
    y = (y - mu) * jax.lax.rsqrt(var + eps) * g1 + be1

    # ---- FFN: linear1 -> relu -> (dropout identity) -> linear2 ----
    h1 = jnp.dot(y.astype(bf16), w1_ref[...], preferred_element_type=f32) + b1_ref[...]
    h1 = jnp.maximum(h1, 0.0)
    ff = jnp.dot(h1.astype(bf16), w2_ref[...], preferred_element_type=f32) + b2

    # ---- residual + LayerNorm2 (dropout2 == identity in eval) ----
    z = y + ff
    mu2 = jnp.mean(z, axis=-1, keepdims=True)
    var2 = jnp.mean((z - mu2) ** 2, axis=-1, keepdims=True)
    z = (z - mu2) * jax.lax.rsqrt(var2 + eps) * g2 + be2

    o_ref[0] = z.astype(o_ref.dtype)


# ---------------------------------------------------------------------------
# Per-layer pallas_call wrapper
# ---------------------------------------------------------------------------
def _encoder_layer(x, pos, p, *, nhead, eps, q_block, exp_bf16, vmem_limit):
    """x, pos: (N, S, E) bf16 (batch-major). Returns (N, S, E) bf16."""
    N, S, E = x.shape
    dff = p["w1"].shape[1]
    H = nhead
    Dh = E // H
    assert E % H == 0
    assert S % q_block == 0 and (q_block == S or q_block % 8 == 0)
    n_q = S // q_block

    def const(shape):
        return pl.BlockSpec(shape, lambda b, q: (0, 0))

    in_specs = [
        pl.BlockSpec((1, S, E), lambda b, q: (b, 0, 0)),   # x   (full seq; resident over q)
        pl.BlockSpec((1, S, E), lambda b, q: (b, 0, 0)),   # pos
        const((E, E)), const((E, E)), const((E, E)), const((E, E)),   # wq wk wv wo
        const((E, dff)), const((dff, E)),                  # w1 w2
        const((9, E)), const((1, dff)),                    # packed vectors, b1
    ]
    out_spec = pl.BlockSpec((1, q_block, E), lambda b, q: (b, q, 0))

    flops = N * (8 * S * E * E + 4 * S * S * E + 4 * S * E * dff)
    transcendentals = N * H * S * S
    bytes_accessed = ((4 * E * E + 2 * E * dff) * 2 + (9 * E + dff) * 4
                      + N * 3 * S * E * 2)

    kernel = functools.partial(_encoder_layer_kernel, nhead=H, q_block=q_block,
                               eps=eps, exp_bf16=exp_bf16)

    return pl.pallas_call(
        kernel,
        out_shape=jax.ShapeDtypeStruct((N, S, E), x.dtype),
        grid=(N, n_q),
        in_specs=in_specs,
        out_specs=out_spec,
        scratch_shapes=[pltpu.VMEM((H, S, Dh), jnp.bfloat16),   # cached K heads
                        pltpu.VMEM((H, S, Dh), jnp.bfloat16)],  # cached V heads
        compiler_params=pltpu.CompilerParams(
            # q axis must be "arbitrary": the K/V scratch cache relies on
            # sequential q iteration within each batch item.
            dimension_semantics=("parallel", "arbitrary"),
            vmem_limit_bytes=vmem_limit),
        cost_estimate=pl.CostEstimate(flops=flops,
                                      transcendentals=transcendentals,
                                      bytes_accessed=bytes_accessed),
    )(x, pos, p["wq"], p["wk"], p["wv"], p["wo"], p["w1"], p["w2"],
      p["vecs"], p["b1"])


# ---------------------------------------------------------------------------
# Parameter preparation (PyTorch layout -> kernel-ready layout)
# ---------------------------------------------------------------------------
def prepare_layer_params(raw, *, nhead, compute_dtype=jnp.bfloat16):
    """raw uses nn.MultiheadAttention / nn.Linear conventions:
       wqkv (3E,E), bqkv (3E,), wo (E,E), bo (E,), w1 (dff,E), b1 (dff,),
       w2 (E,dff), b2 (E,), g1/be1/g2/be2 (E,)."""
    E = raw["wo"].shape[0]
    dff = raw["w1"].shape[0]
    Dh = E // nhead
    scale = jnp.float32(1.0 / np.sqrt(Dh))
    wqkv = raw["wqkv"]
    bqkv = raw["bqkv"].reshape(-1)
    f32 = jnp.float32
    vecs = jnp.stack([
        bqkv[:E] * scale,              # 0 bq (attention scale folded in)
        bqkv[E:2 * E],                 # 1 bk
        bqkv[2 * E:],                  # 2 bv
        raw["bo"].reshape(-1),         # 3 bo
        raw["b2"].reshape(-1),         # 4 b2
        raw["g1"].reshape(-1),         # 5 gamma1
        raw["be1"].reshape(-1),        # 6 beta1
        raw["g2"].reshape(-1),         # 7 gamma2
        raw["be2"].reshape(-1),        # 8 beta2
    ]).astype(f32)                     # (9, E)
    return {
        "wq": (wqkv[:E] * scale).T.astype(compute_dtype),   # (E, E)
        "wk": wqkv[E:2 * E].T.astype(compute_dtype),        # (E, E)
        "wv": wqkv[2 * E:].T.astype(compute_dtype),         # (E, E)
        "wo": raw["wo"].T.astype(compute_dtype),            # (E, E)
        "w1": raw["w1"].T.astype(compute_dtype),            # (E, dff)
        "w2": raw["w2"].T.astype(compute_dtype),            # (dff, E)
        "vecs": vecs,
        "b1": raw["b1"].reshape(1, dff).astype(f32),
    }


# ---------------------------------------------------------------------------
# Full encoder stack
# ---------------------------------------------------------------------------
@functools.partial(jax.jit, static_argnames=("nhead", "eps", "q_block"))
def transformer_encoders(src, pos, layer_params, *, nhead, eps=1e-5, q_block=None):
    """TransformerEncoders.forward (normalize_before=False, withCDP=None, no masks).

    src, pos: (S, N, E) f32 — PyTorch seq-first convention.
    layer_params: list of kernel-ready param dicts (see prepare_layer_params).
    """
    S, N, E = src.shape
    dff = layer_params[0]["w1"].shape[1]

    kind, vmem_phys = _device_info()
    budget = int(vmem_phys * 0.8)                    # ~80% of physical VMEM
    max_block = 256 if "v5" in kind else 512
    qb = q_block if q_block is not None else _pick_q_block(S, E, dff, nhead,
                                                           budget, max_block)
    vmem_limit = int(min(max(_layer_vmem_estimate(S, qb, E, dff, nhead), 32 << 20),
                         budget))
    exp_bf16 = ("v6" in kind) or ("v7" in kind)      # bf16 EUP path only on v6e/v7x

    # Transpose to batch-major ONCE for the whole stack; carry activations in bf16.
    x = jnp.transpose(src, (1, 0, 2)).astype(jnp.bfloat16)   # (N, S, E)
    pe = jnp.transpose(pos, (1, 0, 2)).astype(jnp.bfloat16)
    for lp in layer_params:
        x = _encoder_layer(x, pe, lp, nhead=nhead, eps=eps, q_block=qb,
                           exp_bf16=exp_bf16, vmem_limit=vmem_limit)
    # TODO(synk): normalize_before=True (pre-norm + final encoder LayerNorm), the CDP
    # branch and src_mask / key_padding_mask are dead code for TransformerEncoders'
    # defaults and are not implemented.
    # TODO(synk): for very long sequences a flash-style online-softmax over K/V chunks
    # would bound the (H, Sq, S) score tensor; unnecessary at the target shapes.
    return jnp.transpose(x, (1, 0, 2)).astype(src.dtype)


# ---------------------------------------------------------------------------
# Pure-JAX f32 reference (PyTorch semantics, eval mode)
# ---------------------------------------------------------------------------
def _layer_norm_ref(x, g, b, eps):
    mu = jnp.mean(x, axis=-1, keepdims=True)
    var = jnp.mean((x - mu) ** 2, axis=-1, keepdims=True)
    return (x - mu) * jax.lax.rsqrt(var + eps) * g + b


def _layer_ref(x, pos, raw, nhead, eps):
    S, N, E = x.shape
    Dh = E // nhead
    wqkv, bqkv = raw["wqkv"], raw["bqkv"].reshape(-1)
    qk = x + pos
    q = qk @ wqkv[:E].T + bqkv[:E]
    k = qk @ wqkv[E:2 * E].T + bqkv[E:2 * E]
    v = x @ wqkv[2 * E:].T + bqkv[2 * E:]
    qh = q.reshape(S, N, nhead, Dh) / np.sqrt(Dh)
    kh = k.reshape(S, N, nhead, Dh)
    vh = v.reshape(S, N, nhead, Dh)
    scores = jnp.einsum('qnhd,knhd->nhqk', qh, kh)
    probs = jax.nn.softmax(scores, axis=-1)
    ctx = jnp.einsum('nhqk,knhd->qnhd', probs, vh).reshape(S, N, E)
    attn = ctx @ raw["wo"].T + raw["bo"].reshape(-1)
    y = _layer_norm_ref(x + attn, raw["g1"].reshape(-1), raw["be1"].reshape(-1), eps)
    ff = (jax.nn.relu(y @ raw["w1"].T + raw["b1"].reshape(-1))
          @ raw["w2"].T + raw["b2"].reshape(-1))
    return _layer_norm_ref(y + ff, raw["g2"].reshape(-1), raw["be2"].reshape(-1), eps)


def reference_encoders(src, pos, raw_layers, *, nhead, eps=1e-5):
    x = src
    for raw in raw_layers:
        x = _layer_ref(x, pos, raw, nhead, eps)
    return x


# ---------------------------------------------------------------------------
# Self-test
# ---------------------------------------------------------------------------
if __name__ == "__main__":
    # seq, batch, d_model, nhead, dim_feedforward.  S=16 with q_block=8 gives
    # n_q=2, exercising the cached-K/V (pl.when) path across query tiles.
    S, N, E, H, DFF = 16, 2, 32, 4, 64
    LAYERS = 2

    key = jax.random.PRNGKey(0)
    raw_layers = []
    for _ in range(LAYERS):
        key, *ks = jax.random.split(key, 9)
        raw_layers.append({
            "wqkv": 0.05 * jax.random.normal(ks[0], (3 * E, E), jnp.float32),
            "bqkv": 0.05 * jax.random.normal(ks[1], (3 * E,), jnp.float32),
            "wo":   0.05 * jax.random.normal(ks[2], (E, E), jnp.float32),
            "bo":   0.05 * jax.random.normal(ks[3], (E,), jnp.float32),
            "w1":   0.05 * jax.random.normal(ks[4], (DFF, E), jnp.float32),
            "b1":   0.05 * jax.random.normal(ks[5], (DFF,), jnp.float32),
            "w2":   0.05 * jax.random.normal(ks[6], (E, DFF), jnp.float32),
            "b2":   0.05 * jax.random.normal(ks[7], (E,), jnp.float32),
            # LayerNorm defaults: weight=1, bias=0
            "g1": jnp.ones((E,), jnp.float32), "be1": jnp.zeros((E,), jnp.float32),
            "g2": jnp.ones((E,), jnp.float32), "be2": jnp.zeros((E,), jnp.float32),
        })

    key, k1, k2 = jax.random.split(key, 3)
    src = jax.random.normal(k1, (S, N, E), jnp.float32)
    pos = 0.1 * jax.random.normal(k2, (S, N, E), jnp.float32)

    prepped = [prepare_layer_params(r, nhead=H) for r in raw_layers]

    out = transformer_encoders(src, pos, prepped, nhead=H, q_block=8)
    out = jax.block_until_ready(out)

    ref = reference_encoders(src, pos, raw_layers, nhead=H)
    # Tolerance reflects bf16 activations/matmuls (f32 accumulation), the approx
    # EUP reciprocal and the (v6e/v7x-only) bf16 exp in softmax.
    np.testing.assert_allclose(np.asarray(out), np.asarray(ref), atol=5e-2, rtol=5e-2)

    print("KERNEL_OK")
</pallas_src>

<mosaic_0001>
module attributes {stable_mosaic.version = 11 : i64} {
  func.func @_encoder_layer_kernel(%arg0: i32, %arg1: i32, %arg2: memref<1x16x32xbf16, #tpu.memory_space<vmem>>, %arg3: memref<1x16x32xbf16, #tpu.memory_space<vmem>>, %arg4: memref<32x32xbf16, #tpu.memory_space<vmem>>, %arg5: memref<32x32xbf16, #tpu.memory_space<vmem>>, %arg6: memref<32x32xbf16, #tpu.memory_space<vmem>>, %arg7: memref<32x32xbf16, #tpu.memory_space<vmem>>, %arg8: memref<32x64xbf16, #tpu.memory_space<vmem>>, %arg9: memref<64x32xbf16, #tpu.memory_space<vmem>>, %arg10: memref<9x32xf32, #tpu.memory_space<vmem>>, %arg11: memref<1x64xf32, #tpu.memory_space<vmem>>, %arg12: memref<1x8x32xbf16, #tpu.memory_space<vmem>>, %arg13: memref<4x16x8xbf16, #tpu.memory_space<vmem>>, %arg14: memref<4x16x8xbf16, #tpu.memory_space<vmem>>) attributes {dimension_semantics = [#tpu.dimension_semantics<parallel>, #tpu.dimension_semantics<arbitrary>], iteration_bounds = array<i64: 2, 2>, scalar_prefetch = 0 : i64, scratch_operands = 2 : i64, tpu.core_type = #tpu.core_type<tc>, window_params = [{transform_indices = @transform_0, window_bounds = array<i64: 1, 16, 32>}, {transform_indices = @transform_1, window_bounds = array<i64: 1, 16, 32>}, {pipeline_mode = #tpu.pipeline_mode<synchronous>, transform_indices = @transform_2, window_bounds = array<i64: 32, 32>}, {pipeline_mode = #tpu.pipeline_mode<synchronous>, transform_indices = @transform_3, window_bounds = array<i64: 32, 32>}, {pipeline_mode = #tpu.pipeline_mode<synchronous>, transform_indices = @transform_4, window_bounds = array<i64: 32, 32>}, {pipeline_mode = #tpu.pipeline_mode<synchronous>, transform_indices = @transform_5, window_bounds = array<i64: 32, 32>}, {pipeline_mode = #tpu.pipeline_mode<synchronous>, transform_indices = @transform_6, window_bounds = array<i64: 32, 64>}, {pipeline_mode = #tpu.pipeline_mode<synchronous>, transform_indices = @transform_7, window_bounds = array<i64: 64, 32>}, {pipeline_mode = #tpu.pipeline_mode<synchronous>, transform_indices = @transform_8, window_bounds = array<i64: 9, 32>}, {pipeline_mode = #tpu.pipeline_mode<synchronous>, transform_indices = @transform_9, window_bounds = array<i64: 1, 64>}, {transform_indices = @transform_10, window_bounds = array<i64: 1, 8, 32>}]} {
    %c0 = arith.constant 0 : index
    %c0_0 = arith.constant 0 : index
    %0 = vector.load %arg10[%c0, %c0_0] : memref<9x32xf32, #tpu.memory_space<vmem>>, vector<9x32xf32>
    %1 = vector.extract_strided_slice %0 {offsets = [0, 0], sizes = [1, 32], strides = [1, 1]} : vector<9x32xf32> to vector<1x32xf32>
    %2 = vector.extract_strided_slice %0 {offsets = [1, 0], sizes = [1, 32], strides = [1, 1]} : vector<9x32xf32> to vector<1x32xf32>
    %3 = vector.extract_strided_slice %0 {offsets = [2, 0], sizes = [1, 32], strides = [1, 1]} : vector<9x32xf32> to vector<1x32xf32>
    %4 = vector.extract_strided_slice %0 {offsets = [3, 0], sizes = [1, 32], strides = [1, 1]} : vector<9x32xf32> to vector<1x32xf32>
    %5 = vector.extract_strided_slice %0 {offsets = [4, 0], sizes = [1, 32], strides = [1, 1]} : vector<9x32xf32> to vector<1x32xf32>
    %6 = vector.extract_strided_slice %0 {offsets = [5, 0], sizes = [1, 32], strides = [1, 1]} : vector<9x32xf32> to vector<1x32xf32>
    %7 = vector.extract_strided_slice %0 {offsets = [6, 0], sizes = [1, 32], strides = [1, 1]} : vector<9x32xf32> to vector<1x32xf32>
    %8 = vector.extract_strided_slice %0 {offsets = [7, 0], sizes = [1, 32], strides = [1, 1]} : vector<9x32xf32> to vector<1x32xf32>
    %9 = vector.extract_strided_slice %0 {offsets = [8, 0], sizes = [1, 32], strides = [1, 1]} : vector<9x32xf32> to vector<1x32xf32>
    %c0_1 = arith.constant 0 : index
    %c0_2 = arith.constant 0 : index
    %c0_3 = arith.constant 0 : index
    %10 = vector.load %arg2[%c0_1, %c0_2, %c0_3] : memref<1x16x32xbf16, #tpu.memory_space<vmem>>, vector<1x16x32xbf16>
    %11 = vector.shape_cast %10 : vector<1x16x32xbf16> to vector<16x32xbf16>
    %c0_4 = arith.constant 0 : index
    %c0_5 = arith.constant 0 : index
    %c0_6 = arith.constant 0 : index
    %12 = vector.load %arg3[%c0_4, %c0_5, %c0_6] : memref<1x16x32xbf16, #tpu.memory_space<vmem>>, vector<1x16x32xbf16>
    %13 = vector.shape_cast %12 : vector<1x16x32xbf16> to vector<16x32xbf16>
    %c0_i32 = arith.constant 0 : i32
    %14 = arith.cmpi eq, %arg1, %c0_i32 : i32
    %15 = arith.extui %14 : i1 to i32
    %c0_i32_7 = arith.constant 0 : i32
    %16 = arith.cmpi ne, %15, %c0_i32_7 : i32
    scf.if %16 {
      %119 = arith.addf %11, %13 : vector<16x32xbf16>
      %c0_49 = arith.constant 0 : index
      %c0_50 = arith.constant 0 : index
      %120 = vector.load %arg5[%c0_49, %c0_50] : memref<32x32xbf16, #tpu.memory_space<vmem>>, vector<32x32xbf16>
      %cst_51 = arith.constant dense<0.000000e+00> : vector<16x32xf32>
      %121 = tpu.matmul %119, %120, %cst_51 {dimension_numbers = #tpu.dot_dimension_numbers<[1], [0], [0], [1], [0, 0, 1, 1], [], []>} : vector<16x32xbf16>, vector<32x32xbf16>, vector<16x32xf32> -> vector<16x32xf32>
      %122 = vector.broadcast %2 : vector<1x32xf32> to vector<16x32xf32>
      %123 = arith.addf %121, %122 : vector<16x32xf32>
      %c0_52 = arith.constant 0 : index
      %c0_53 = arith.constant 0 : index
      %124 = vector.load %arg6[%c0_52, %c0_53] : memref<32x32xbf16, #tpu.memory_space<vmem>>, vector<32x32xbf16>
      %cst_54 = arith.constant dense<0.000000e+00> : vector<16x32xf32>
      %125 = tpu.matmul %11, %124, %cst_54 {dimension_numbers = #tpu.dot_dimension_numbers<[1], [0], [0], [1], [0, 0, 1, 1], [], []>} : vector<16x32xbf16>, vector<32x32xbf16>, vector<16x32xf32> -> vector<16x32xf32>
      %126 = vector.broadcast %3 : vector<1x32xf32> to vector<16x32xf32>
      %127 = arith.addf %125, %126 : vector<16x32xf32>
      %128 = arith.truncf %123 : vector<16x32xf32> to vector<16x32xbf16>
      %129 = vector.shape_cast %128 : vector<16x32xbf16> to vector<16x4x8xbf16>
      %130 = tpu.transpose %129, [1, 0, 2] : vector<16x4x8xbf16> -> vector<4x16x8xbf16>
      %c0_55 = arith.constant 0 : index
      %c0_56 = arith.constant 0 : index
      %c0_57 = arith.constant 0 : index
      %131 = vector.load %arg13[%c0_55, %c0_56, %c0_57] : memref<4x16x8xbf16, #tpu.memory_space<vmem>>, vector<4x16x8xbf16>
      tpu.vector_store %arg13[%c0_55, %c0_56, %c0_57], %130 {strides = array<i32>} : memref<4x16x8xbf16, #tpu.memory_space<vmem>>, vector<4x16x8xbf16>,
      %132 = arith.truncf %127 : vector<16x32xf32> to vector<16x32xbf16>
      %133 = vector.shape_cast %132 : vector<16x32xbf16> to vector<16x4x8xbf16>
      %134 = tpu.transpose %133, [1, 0, 2] : vector<16x4x8xbf16> -> vector<4x16x8xbf16>
      %c0_58 = arith.constant 0 : index
      %c0_59 = arith.constant 0 : index
      %c0_60 = arith.constant 0 : index
      %135 = vector.load %arg14[%c0_58, %c0_59, %c0_60] : memref<4x16x8xbf16, #tpu.memory_space<vmem>>, vector<4x16x8xbf16>
      tpu.vector_store %arg14[%c0_58, %c0_59, %c0_60], %134 {strides = array<i32>} : memref<4x16x8xbf16, #tpu.memory_space<vmem>>, vector<4x16x8xbf16>,
    } else {
    }
    %c8_i32 = arith.constant 8 : i32
    %17 = arith.muli %arg1, %c8_i32 : i32
    %18 = tpu.assume_multiple %17, 8 : i32
    %c0_8 = arith.constant 0 : index
    %19 = arith.index_cast %18 : i32 to index
    %c0_9 = arith.constant 0 : index
    %20 = vector.load %arg2[%c0_8, %19, %c0_9] : memref<1x16x32xbf16, #tpu.memory_space<vmem>>, vector<1x8x32xbf16>
    %21 = vector.shape_cast %20 : vector<1x8x32xbf16> to vector<8x32xbf16>
    %c0_10 = arith.constant 0 : index
    %22 = arith.index_cast %18 : i32 to index
    %c0_11 = arith.constant 0 : index
    %23 = vector.load %arg3[%c0_10, %22, %c0_11] : memref<1x16x32xbf16, #tpu.memory_space<vmem>>, vector<1x8x32xbf16>
    %24 = vector.shape_cast %23 : vector<1x8x32xbf16> to vector<8x32xbf16>
    %25 = arith.addf %21, %24 : vector<8x32xbf16>
    %c0_12 = arith.constant 0 : index
    %c0_13 = arith.constant 0 : index
    %26 = vector.load %arg4[%c0_12, %c0_13] : memref<32x32xbf16, #tpu.memory_space<vmem>>, vector<32x32xbf16>
    %cst = arith.constant dense<0.000000e+00> : vector<8x32xf32>
    %27 = tpu.matmul %25, %26, %cst {dimension_numbers = #tpu.dot_dimension_numbers<[1], [0], [0], [1], [0, 0, 1, 1], [], []>} : vector<8x32xbf16>, vector<32x32xbf16>, vector<8x32xf32> -> vector<8x32xf32>
    %28 = vector.broadcast %1 : vector<1x32xf32> to vector<8x32xf32>
    %29 = arith.addf %27, %28 : vector<8x32xf32>
    %30 = arith.truncf %29 : vector<8x32xf32> to vector<8x32xbf16>
    %31 = vector.shape_cast %30 : vector<8x32xbf16> to vector<8x4x8xbf16>
    %32 = tpu.transpose %31, [1, 0, 2] : vector<8x4x8xbf16> -> vector<4x8x8xbf16>
    %c0_14 = arith.constant 0 : index
    %c0_15 = arith.constant 0 : index
    %c0_16 = arith.constant 0 : index
    %33 = vector.load %arg13[%c0_14, %c0_15, %c0_16] : memref<4x16x8xbf16, #tpu.memory_space<vmem>>, vector<4x16x8xbf16>
    "tpu.trace_start"() <{level = 10 : i32, message = "hqd,hkd->hqk"}> : () -> ()
    %cst_17 = arith.constant dense<0.000000e+00> : vector<4x8x16xf32>
    %34 = tpu.matmul %32, %33, %cst_17 {dimension_numbers = #tpu.dot_dimension_numbers<[2], [2], [1], [1], [0, 0, 0, 1, 1, 1], [0], [0]>} : vector<4x8x8xbf16>, vector<4x16x8xbf16>, vector<4x8x16xf32> -> vector<4x8x16xf32>
    "tpu.trace_stop"() : () -> ()
    %cst_18 = arith.constant dense<0xFF800000> : vector<4x8xf32>
    %35 = vector.multi_reduction <maximumf>, %34, %cst_18 [2] : vector<4x8x16xf32> to vector<4x8xf32>
    %36 = vector.shape_cast %35 : vector<4x8xf32> to vector<4x8x1xf32>
    %37 = vector.broadcast %36 : vector<4x8x1xf32> to vector<4x8x16xf32>
    %38 = arith.subf %34, %37 : vector<4x8x16xf32>
    %39 = math.exp %38 : vector<4x8x16xf32>
    %cst_19 = arith.constant dense<0.000000e+00> : vector<4x8xf32>
    %40 = vector.multi_reduction <add>, %39, %cst_19 [2] : vector<4x8x16xf32> to vector<4x8xf32>
    %41 = vector.shape_cast %40 : vector<4x8xf32> to vector<4x8x1xf32>
    %42 = tpu.reciprocal %41 {approx = true} : vector<4x8x1xf32> -> vector<4x8x1xf32>
    %43 = vector.broadcast %42 : vector<4x8x1xf32> to vector<4x8x16xf32>
    %44 = arith.mulf %39, %43 : vector<4x8x16xf32>
    %45 = arith.truncf %44 : vector<4x8x16xf32> to vector<4x8x16xbf16>
    %c0_20 = arith.constant 0 : index
    %c0_21 = arith.constant 0 : index
    %c0_22 = arith.constant 0 : index
    %46 = vector.load %arg14[%c0_20, %c0_21, %c0_22] : memref<4x16x8xbf16, #tpu.memory_space<vmem>>, vector<4x16x8xbf16>
    "tpu.trace_start"() <{level = 10 : i32, message = "hqk,hkd->hqd"}> : () -> ()
    %cst_23 = arith.constant dense<0.000000e+00> : vector<4x8x8xf32>
    %47 = tpu.matmul %45, %46, %cst_23 {dimension_numbers = #tpu.dot_dimension_numbers<[2], [1], [1], [2], [0, 0, 0, 1, 1, 2], [0], [0]>} : vector<4x8x16xbf16>, vector<4x16x8xbf16>, vector<4x8x8xf32> -> vector<4x8x8xf32>
    "tpu.trace_stop"() : () -> ()
    %48 = tpu.transpose %47, [1, 0, 2] : vector<4x8x8xf32> -> vector<8x4x8xf32>
    %49 = vector.shape_cast %48 : vector<8x4x8xf32> to vector<8x32xf32>
    %50 = arith.truncf %49 : vector<8x32xf32> to vector<8x32xbf16>
    %c0_24 = arith.constant 0 : index
    %c0_25 = arith.constant 0 : index
    %51 = vector.load %arg7[%c0_24, %c0_25] : memref<32x32xbf16, #tpu.memory_space<vmem>>, vector<32x32xbf16>
    %cst_26 = arith.constant dense<0.000000e+00> : vector<8x32xf32>
    %52 = tpu.matmul %50, %51, %cst_26 {dimension_numbers = #tpu.dot_dimension_numbers<[1], [0], [0], [1], [0, 0, 1, 1], [], []>} : vector<8x32xbf16>, vector<32x32xbf16>, vector<8x32xf32> -> vector<8x32xf32>
    %53 = vector.broadcast %4 : vector<1x32xf32> to vector<8x32xf32>
    %54 = arith.addf %52, %53 : vector<8x32xf32>
    %55 = arith.extf %21 : vector<8x32xbf16> to vector<8x32xf32>
    %56 = arith.addf %55, %54 : vector<8x32xf32>
    %cst_27 = arith.constant dense<0.000000e+00> : vector<8xf32>
    %57 = vector.multi_reduction <add>, %56, %cst_27 [1] : vector<8x32xf32> to vector<8xf32>
    %58 = vector.shape_cast %57 : vector<8xf32> to vector<8x1xf32>
    %cst_28 = arith.constant 3.200000e+01 : f32
    %59 = vector.broadcast %cst_28 : f32 to vector<8x1xf32>
    %60 = arith.divf %58, %59 : vector<8x1xf32>
    %61 = vector.broadcast %60 : vector<8x1xf32> to vector<8x32xf32>
    %62 = arith.subf %56, %61 : vector<8x32xf32>
    %63 = arith.mulf %62, %62 : vector<8x32xf32>
    %cst_29 = arith.constant dense<0.000000e+00> : vector<8xf32>
    %64 = vector.multi_reduction <add>, %63, %cst_29 [1] : vector<8x32xf32> to vector<8xf32>
    %65 = vector.shape_cast %64 : vector<8xf32> to vector<8x1xf32>
    %cst_30 = arith.constant 3.200000e+01 : f32
    %66 = vector.broadcast %cst_30 : f32 to vector<8x1xf32>
    %67 = arith.divf %65, %66 : vector<8x1xf32>
    %68 = vector.broadcast %60 : vector<8x1xf32> to vector<8x32xf32>
    %69 = arith.subf %56, %68 : vector<8x32xf32>
    %cst_31 = arith.constant 9.99999974E-6 : f32
    %70 = vector.broadcast %cst_31 : f32 to vector<8x1xf32>
    %71 = arith.addf %67, %70 : vector<8x1xf32>
    %72 = math.rsqrt %71 : vector<8x1xf32>
    %73 = vector.broadcast %72 : vector<8x1xf32> to vector<8x32xf32>
    %74 = arith.mulf %69, %73 : vector<8x32xf32>
    %75 = vector.broadcast %6 : vector<1x32xf32> to vector<8x32xf32>
    %76 = arith.mulf %74, %75 : vector<8x32xf32>
    %77 = vector.broadcast %7 : vector<1x32xf32> to vector<8x32xf32>
    %78 = arith.addf %76, %77 : vector<8x32xf32>
    %79 = arith.truncf %78 : vector<8x32xf32> to vector<8x32xbf16>
    %c0_32 = arith.constant 0 : index
    %c0_33 = arith.constant 0 : index
    %80 = vector.load %arg8[%c0_32, %c0_33] : memref<32x64xbf16, #tpu.memory_space<vmem>>, vector<32x64xbf16>
    %cst_34 = arith.constant dense<0.000000e+00> : vector<8x64xf32>
    %81 = tpu.matmul %79, %80, %cst_34 {dimension_numbers = #tpu.dot_dimension_numbers<[1], [0], [0], [1], [0, 0, 1, 1], [], []>} : vector<8x32xbf16>, vector<32x64xbf16>, vector<8x64xf32> -> vector<8x64xf32>
    %c0_35 = arith.constant 0 : index
    %c0_36 = arith.constant 0 : index
    %82 = vector.load %arg11[%c0_35, %c0_36] : memref<1x64xf32, #tpu.memory_space<vmem>>, vector<1x64xf32>
    %83 = vector.broadcast %82 : vector<1x64xf32> to vector<8x64xf32>
    %84 = arith.addf %81, %83 : vector<8x64xf32>
    %cst_37 = arith.constant 0.000000e+00 : f32
    %85 = vector.broadcast %cst_37 : f32 to vector<8x64xf32>
    %86 = arith.maximumf %84, %85 : vector<8x64xf32>
    %87 = arith.truncf %86 : vector<8x64xf32> to vector<8x64xbf16>
    %c0_38 = arith.constant 0 : index
    %c0_39 = arith.constant 0 : index
    %88 = vector.load %arg9[%c0_38, %c0_39] : memref<64x32xbf16, #tpu.memory_space<vmem>>, vector<64x32xbf16>
    %cst_40 = arith.constant dense<0.000000e+00> : vector<8x32xf32>
    %89 = tpu.matmul %87, %88, %cst_40 {dimension_numbers = #tpu.dot_dimension_numbers<[1], [0], [0], [1], [0, 0, 1, 1], [], []>} : vector<8x64xbf16>, vector<64x32xbf16>, vector<8x32xf32> -> vector<8x32xf32>
    %90 = vector.broadcast %5 : vector<1x32xf32> to vector<8x32xf32>
    %91 = arith.addf %89, %90 : vector<8x32xf32>
    %92 = arith.addf %78, %91 : vector<8x32xf32>
    %cst_41 = arith.constant dense<0.000000e+00> : vector<8xf32>
    %93 = vector.multi_reduction <add>, %92, %cst_41 [1] : vector<8x32xf32> to vector<8xf32>
    %94 = vector.shape_cast %93 : vector<8xf32> to vector<8x1xf32>
    %cst_42 = arith.constant 3.200000e+01 : f32
    %95 = vector.broadcast %cst_42 : f32 to vector<8x1xf32>
    %96 = arith.divf %94, %95 : vector<8x1xf32>
    %97 = vector.broadcast %96 : vector<8x1xf32> to vector<8x32xf32>
    %98 = arith.subf %92, %97 : vector<8x32xf32>
    %99 = arith.mulf %98, %98 : vector<8x32xf32>
    %cst_43 = arith.constant dense<0.000000e+00> : vector<8xf32>
    %100 = vector.multi_reduction <add>, %99, %cst_43 [1] : vector<8x32xf32> to vector<8xf32>
    %101 = vector.shape_cast %100 : vector<8xf32> to vector<8x1xf32>
    %cst_44 = arith.constant 3.200000e+01 : f32
    %102 = vector.broadcast %cst_44 : f32 to vector<8x1xf32>
    %103 = arith.divf %101, %102 : vector<8x1xf32>
    %104 = vector.broadcast %96 : vector<8x1xf32> to vector<8x32xf32>
    %105 = arith.subf %92, %104 : vector<8x32xf32>
    %cst_45 = arith.constant 9.99999974E-6 : f32
    %106 = vector.broadcast %cst_45 : f32 to vector<8x1xf32>
    %107 = arith.addf %103, %106 : vector<8x1xf32>
    %108 = math.rsqrt %107 : vector<8x1xf32>
    %109 = vector.broadcast %108 : vector<8x1xf32> to vector<8x32xf32>
    %110 = arith.mulf %105, %109 : vector<8x32xf32>
    %111 = vector.broadcast %8 : vector<1x32xf32> to vector<8x32xf32>
    %112 = arith.mulf %110, %111 : vector<8x32xf32>
    %113 = vector.broadcast %9 : vector<1x32xf32> to vector<8x32xf32>
    %114 = arith.addf %112, %113 : vector<8x32xf32>
    %115 = arith.truncf %114 : vector<8x32xf32> to vector<8x32xbf16>
    %c0_46 = arith.constant 0 : index
    %c0_47 = arith.constant 0 : index
    %c0_48 = arith.constant 0 : index
    %116 = vector.load %arg12[%c0_46, %c0_47, %c0_48] : memref<1x8x32xbf16, #tpu.memory_space<vmem>>, vector<1x8x32xbf16>
    %117 = vector.shape_cast %116 : vector<1x8x32xbf16> to vector<8x32xbf16>
    %118 = vector.shape_cast %115 : vector<8x32xbf16> to vector<1x8x32xbf16>
    tpu.vector_store %arg12[%c0_46, %c0_47, %c0_48], %118 {strides = array<i32>} : memref<1x8x32xbf16, #tpu.memory_space<vmem>>, vector<1x8x32xbf16>,
    return
  }
  func.func @transform_0(%arg0: i32, %arg1: i32) -> (i32, i32, i32) {
    %c0_i32 = arith.constant 0 : i32
    %c0_i32_0 = arith.constant 0 : i32
    %c0_i32_1 = arith.constant 0 : i32
    return %arg0, %c0_i32, %c0_i32_0 : i32, i32, i32
  }
  func.func @transform_1(%arg0: i32, %arg1: i32) -> (i32, i32, i32) {
    %c0_i32 = arith.constant 0 : i32
    %c0_i32_0 = arith.constant 0 : i32
    %c0_i32_1 = arith.constant 0 : i32
    return %arg0, %c0_i32, %c0_i32_0 : i32, i32, i32
  }
  func.func @transform_2(%arg0: i32, %arg1: i32) -> (i32, i32) {
    %c0_i32 = arith.constant 0 : i32
    %c0_i32_0 = arith.constant 0 : i32
    %c0_i32_1 = arith.constant 0 : i32
    return %c0_i32, %c0_i32_0 : i32, i32
  }
  func.func @transform_3(%arg0: i32, %arg1: i32) -> (i32, i32) {
    %c0_i32 = arith.constant 0 : i32
    %c0_i32_0 = arith.constant 0 : i32
    %c0_i32_1 = arith.constant 0 : i32
    return %c0_i32, %c0_i32_0 : i32, i32
  }
  func.func @transform_4(%arg0: i32, %arg1: i32) -> (i32, i32) {
    %c0_i32 = arith.constant 0 : i32
    %c0_i32_0 = arith.constant 0 : i32
    %c0_i32_1 = arith.constant 0 : i32
    return %c0_i32, %c0_i32_0 : i32, i32
  }
  func.func @transform_5(%arg0: i32, %arg1: i32) -> (i32, i32) {
    %c0_i32 = arith.constant 0 : i32
    %c0_i32_0 = arith.constant 0 : i32
    %c0_i32_1 = arith.constant 0 : i32
    return %c0_i32, %c0_i32_0 : i32, i32
  }
  func.func @transform_6(%arg0: i32, %arg1: i32) -> (i32, i32) {
    %c0_i32 = arith.constant 0 : i32
    %c0_i32_0 = arith.constant 0 : i32
    %c0_i32_1 = arith.constant 0 : i32
    return %c0_i32, %c0_i32_0 : i32, i32
  }
  func.func @transform_7(%arg0: i32, %arg1: i32) -> (i32, i32) {
    %c0_i32 = arith.constant 0 : i32
    %c0_i32_0 = arith.constant 0 : i32
    %c0_i32_1 = arith.constant 0 : i32
    return %c0_i32, %c0_i32_0 : i32, i32
  }
  func.func @transform_8(%arg0: i32, %arg1: i32) -> (i32, i32) {
    %c0_i32 = arith.constant 0 : i32
    %c0_i32_0 = arith.constant 0 : i32
    %c0_i32_1 = arith.constant 0 : i32
    return %c0_i32, %c0_i32_0 : i32, i32
  }
  func.func @transform_9(%arg0: i32, %arg1: i32) -> (i32, i32) {
    %c0_i32 = arith.constant 0 : i32
    %c0_i32_0 = arith.constant 0 : i32
    %c0_i32_1 = arith.constant 0 : i32
    return %c0_i32, %c0_i32_0 : i32, i32
  }
  func.func @transform_10(%arg0: i32, %arg1: i32) -> (i32, i32, i32) {
    %c0_i32 = arith.constant 0 : i32
    %c0_i32_0 = arith.constant 0 : i32
    return %arg0, %arg1, %c0_i32 : i32, i32, i32
  }
}

</mosaic_0001>

<bundles_post_ra>
// kernel: transformer_encoders.2
= control target key start
LH: loop header
LB: loop body
LE: loop exit
PB: predicated region body
PF: predicated region fallthrough
CT: control target
= control target key end

     0   :  { %s2686_s13 = smov 0   ;;  %s2688_s14 = smov 0   ;;  %s3036_s0 = inlined_call_operand.vmem [shape: bf16[2,16,32], index: 0, kind: input, shape index: {}]   ;;  %s3037_s1 = inlined_call_operand.vmem [shape: bf16[2,16,32], index: 1, kind: input, shape index: {}]   ;;  %s3038_s2 = inlined_call_operand.vmem [shape: bf16[32,32], index: 2, kind: input, shape index: {}]   ;;  %s3039_s3 = inlined_call_operand.vmem [shape: bf16[32,32], index: 3, kind: input, shape index: {}]   ;;  %s3040_s4 = inlined_call_operand.vmem [shape: bf16[32,32], index: 4, kind: input, shape index: {}]   ;;  %s3041_s5 = inlined_call_operand.vmem [shape: bf16[32,32], index: 5, kind: input, shape index: {}]   ;;  %s3042_s6 = inlined_call_operand.vmem [shape: bf16[32,64], index: 6, kind: input, shape index: {}]   ;;  %s3043_s7 = inlined_call_operand.vmem [shape: bf16[64,32], index: 7, kind: input, shape index: {}]   ;;  %s3044_s8 = inlined_call_operand.vmem [shape: f32[9,32], index: 8, kind: input, shape index: {}]   ;;  %s3045_s9 = inlined_call_operand.vmem [shape: f32[1,64], index: 9, kind: input, shape index: {}]   ;;  %s3046_s10 = inlined_call_operand.vmem [shape: bf16[2,16,32], index: 10, kind: output, shape index: {}]  }
   0x1   :  { %s2690_s15 = smov 0   ;;  %s2692_s16 = smov 0  }
   0x2   :  { %s2694_s17 = smov 0  }
   0x3 LB: > { %s29_s18 = sadd.s32 1, %s2602_s15  ;;  %s32_s19 = sadd.s32 1, %s2606_s16  ;;  %s2610_s17 = sphi %s2694_s17, %s20_s17   ;;  %s2606_s16 = sphi %s2692_s16, %s3050_s16   ;;  %s2602_s15 = sphi %s2690_s15, %s3049_s15   ;;  %s2598_s14 = sphi %s2688_s14, %s3048_s14   ;;  %s2594_s13 = sphi %s2686_s13, %s3047_s13  }
   0x4   : > { %p30_p0 = scmp.ge.s32.totalorder %s29_s18, 2  ;;  %p2286_p1 = scmp.ge.s32.totalorder %s2610_s17, 1 }
   0x5   : > { %p336_p2 = scmp.lt.s32.totalorder %s2610_s17, 5 }
   0x6   : > { %s3052_s18 = smov (%p30_p0, %s29_s18), 0  ;;  %s3054_s19 = smov (!%p30_p0, %s32_s19), %s2606_s16 }
   0x7   : > { %p337_p3 = pnand %p2286_p1, %p336_p2  ;;  %p34_p4 = scmp.ge.s32.totalorder %s3054_s19, 2 }
   0x8   : > { %p382_p5 = scmp.lt.s32.totalorder (!%p337_p3), %s2598_s14, 1  ;;  %p394_p6 = scmp.lt.s32.totalorder (!%p337_p3), %s2594_s13, 1  ;;  %v2722_v0 = vld [vmem:[%s3044_s8] sm:$0xff] (!%p337_p3)  ;;  %v2727_v1 = vld [vmem:[%s3044_s8 + $0x8] ss:$0 sm:$0xff] (!%p337_p3) }
   0x9   : > { %s3056_s19 = smov (%p34_p4, %s3054_s19), 0  ;;  %340 = sbr.rel (%p337_p3) target bundleno = 2945 (0xb81), region = 60 }
   0xa   : > { %p2293_p7 = scmp.ne.s32.totalorder (!%p337_p3), %s2594_s13, 0 }
  0x10   : > { %s3058_s14 = smov (!%p382_p5, %s2598_s14), 1  ;;  %410 = sbr.rel (%p2293_p7) target bundleno = 407 (0x197), region = 64 }
  0x11   : > { %s395_s24 = scalar_select %p394_p6, %s2594_s13, 1 }
  0x12   : > { %s2341_s25 = sshll.u32 %s3058_s14, 3  ;;  %s2291_s26 = sshll.u32 %s3058_s14, 1  ;;  %v2538_v6 = vld [vmem:[%s3039_s3] sm:$0xff] (!%p2293_p7)   ;;  %v2612_v7 = vmov (!%p2293_p7), 0.0   ;;  %v2540_v11 = vld [vmem:[%s3039_s3 + $0x8] sm:$0xff] (!%p2293_p7)   ;;  %vm2613_vm0 = vmmov (!%p2293_p7), 0   ;;  %v417_v15 = vlaneseq (!%p2293_p7) }
  0x13   : > { %s2733_s29 = scalar_lea.vmem %s3036_s0, %s2341_s25  ;;  %s2738_s12 = scalar_lea.vmem %s3037_s1, %s2341_s25  ;;  %2379 = vmatprep.subr.bf16.mxu0 (!%p2293_p7), %v2612_v7  ;;  %2387 = vmatprep.subr.bf16.mxu1 (!%p2293_p7), %v2612_v7  ;;  %v2539_v8 = vld [vmem:[%s3040_s4] sm:$0xff] (!%p2293_p7)   ;;  %v2541_v12 = vld [vmem:[%s3040_s4 + $0x8] sm:$0xff] (!%p2293_p7)   ;;  %vm438_vm1 = vcmask (!%p2293_p7), 261120   ;;  %v2617_v35 = vmov (!%p2293_p7), 1983009808   ;;  %v2619_v40 = vmov (!%p2293_p7), 0  }
  0x14   : > { %s397_s20 = sadd.s32 %s2291_s26, %s395_s24  ;;  %v403_v2 = vld [vmem:[%s2733_s29] sm:$0xf]  ;;  %v404_v3 = vld [vmem:[%s2733_s29 + $0x4] sm:$0xf]  ;;  %2380 = vmatpush3.bf16.msra.mxu0 (!%p2293_p7), %v2538_v6  ;;  %2383 = vmatprep.mubr.msk.bf16.mxu0 (!%p2293_p7), %vm2613_vm0, %v2612_v7  ;;  %v418_v16 = vshrl.u32 (!%p2293_p7), %v417_v15, 7  ;;  %s2615_s14 = smov (!%p2293_p7), 120   ;;  %v584_v36 = vunpack.c.l.s4 (!%p2293_p7), %v2617_v35  ;;  %v2764_v41 = vpack.i.b16 (!%p2293_p7), %v2619_v40, %v2619_v40 }
  0x15   : > { %v405_v4 = vld [vmem:[%s2738_s12] sm:$0xf]  ;;  %s2292_s21 = sshll.u32 %s397_s20, 2  ;;  %v406_v5 = vld [vmem:[%s2738_s12 + $0x4] sm:$0xf]  ;;  %2388 = vmatpush3.bf16.msra.mxu1 (!%p2293_p7), %v2539_v8  ;;  %2381 = vmatprep.subr.bf16.mxu0 (!%p2293_p7), %v2612_v7  ;;  %v2298_v14 = vcombine.low (!%p2293_p7), %v403_v2, %v404_v3  ;;  %s2616_s22 = smov (!%p2293_p7), 112  }
  0x16   : > { %s2747_s23 = scalar_lea.vmem %s3046_s10, %s2292_s21  ;;  %v411_v9 = vadd.bf16 (!%p2293_p7), %v405_v4, %v403_v2  ;;  %v412_v10 = vadd.bf16 (!%p2293_p7), %v406_v5, %v404_v3  ;;  %2389 = vmatprep.subr.bf16.mxu1 (!%p2293_p7), %v2612_v7  ;;  %2391 = vmatprep.mubr.msk.bf16.mxu1 (!%p2293_p7), %vm2613_vm0, %v2612_v7  ;;  %v489_v17 = vsub.s32 (!%p2293_p7), 2, %v418_v16  ;;  %v419_v18 = vsub.s32 (!%p2293_p7), 1, %v418_v16  ;;  %s2614_s21 = smov (!%p2293_p7), 104  }
  0x17   : > { %v2618_v37 = vmov 1934713408   ;;  %v585_v39 = vunpack.c.0.s8 %v584_v36  ;;  %vm830_vm2 = vcmask 64512  }
  0x18   : > { %v2294_v13 = vcombine.low %v411_v9, %v412_v10  ;;  %2382 = vmatpush3.bf16.msra.mxu0 %v2540_v11  ;;  %v490_v19 = vrot.slane %v2722_v0, %v489_v17  ;;  %v420_v20 = vrot.slane %v2722_v0, %v419_v18  ;;  %v615_v38 = vunpack.c.l.s4 %v2618_v37 }
  0x19   : > { %2390 = vmatpush3.bf16.msra.mxu1 %v2541_v12  ;;  %v2766_v45 = vsub.s32 %v585_v39, %v418_v16 }
  0x1a   : > { %v616_v42 = vunpack.c.0.s8 %v615_v38 }
  0x1b   : > { %2384 = vmatmul.mubr.msk.bf16.vlgmr.msra.gmra.mrb[0].mxu0 %vm438_vm1, %v2294_v13 }
  0x1c   : > { %2392 = vmatmul.mubr.msk.bf16.vlgmr.msra.gmra.mrb[0].mxu1 %vm438_vm1, %v2298_v14  ;;  %v2769_v51 = vsub.s32 %v616_v42, %v418_v16 }
  0xee   : > { %v476_v21 = vpop.f32.mrb[0].mxu0 }
  0xef   : > { %v2385_v22 = vpop.f32.mrb[1].mxu0  ;;  %v545_v23 = vpop.f32.mrb[0].mxu1  ;;  %v477_v27 = vadd.f32 %v476_v21, %v420_v20 }
  0xf0   : > { %v546_v24 = vadd.f32 %v545_v23, %v490_v19  ;;  %v479_v25 = vpop.f32.mrb[2].mxu0  ;;  %v2393_v26 = vpop.f32.mrb[1].mxu1 }
  0xf1   : > { %v480_v28 = vadd.f32 %v479_v25, %v420_v20  ;;  %v2386_v29 = vpop.f32.mrb[3].mxu0  ;;  %v548_v30 = vpop.f32.mrb[2].mxu1 }
  0xf2   : > { %v549_v31 = vadd.f32 %v548_v30, %v490_v19  ;;  %v2394_v32 = vpop.f32.mrb[3].mxu1 }
  0xf3   : > { %v552_v33 = vpack.c.bf16 %v480_v28, %v477_v27 }
  0xf4   : > { %v835_v34 = vpack.c.bf16 %v549_v31, %v546_v24 }
  0xf5   : > { %558 = vrot.lane.b32.xlu1 %v552_v33, %s2614_s21  ;;  %554 = vrot.lane.b32.xlu0 %v552_v33, %s2615_s14  ;;  %v564_v47 = vshrl.u32 %v552_v33, 16 }
  0xf6   : > { %v847_v52 = vshrl.u32 %v835_v34, 16 }
  0xf9   : > { %837 = vrot.lane.b32.xlu1 %v835_v34, %s2615_s14  ;;  %556 = vrot.lane.b32.xlu0 %v552_v33, %s2616_s22 }
  0xfd   : > { %841 = vrot.lane.b32.xlu1 %v835_v34, %s2614_s21  ;;  %839 = vrot.lane.b32.xlu0 %v835_v34, %s2616_s22 }
 0x167   : > { %v559_v43 = vpop.permute.xlu1 %558  ;;  %v555_v44 = vpop.permute.xlu0 %554 }
 0x168   : > { %v562_v46 = vpack.i.b16 %v555_v44, %v552_v33  ;;  %v565_v48 = vshrl.u32 %v555_v44, 16  ;;  %v573_v55 = vshrl.u32 %v559_v43, 16 }
 0x16a   : > { %v566_v49 = vpack.i.b16 %v565_v48, %v564_v47  ;;  %v582_v50 = vcombine.high %v562_v46, %v2764_v41  ;;  %v589_v56 = vrot.slane %v562_v46, %v2766_v45 }
 0x16b   : > { %v838_v53 = vpop.permute.xlu1 %837  ;;  %v557_v54 = vpop.permute.xlu0 %556 }
 0x16c   : > { %v648_v57 = vcombine.high %v566_v49, %v2764_v41  ;;  %v845_v58 = vpack.i.b16 %v838_v53, %v835_v34  ;;  %v596_v59 = vrot.slane %v582_v50, %v2766_v45  ;;  %v848_v60 = vshrl.u32 %v838_v53, 16 }
 0x16d   : > { %v570_v61 = vpack.i.b16 %v559_v43, %v557_v54  ;;  %v572_v62 = vshrl.u32 %v557_v54, 16  ;;  %v655_v63 = vrot.slane %v566_v49, %v2766_v45 }
 0x16e   : > { %v662_v2 = vrot.slane %v648_v57, %v2766_v45  ;;  %v859_v3 = vcombine.high %v845_v58, %v2764_v41  ;;  %v2778_v4 = vrot.slane %v845_v58, %v2766_v45  ;;  %v849_v5 = vpack.i.b16 %v848_v60, %v847_v52 }
 0x16f   : > { %v574_v6 = vpack.i.b16 %v573_v55, %v572_v62  ;;  %v597_v7 = vcombine.high %v570_v61, %v2764_v41  ;;  %v604_v8 = vrot.slane %v570_v61, %v2766_v45  ;;  %v842_v9 = vpop.permute.xlu1 %841  ;;  %v840_v10 = vpop.permute.xlu0 %839 }
 0x170   : > { %v2783_v11 = vrot.slane %v859_v3, %v2766_v45  ;;  %v856_v12 = vshrl.u32 %v842_v9, 16  ;;  %v853_v13 = vpack.i.b16 %v842_v9, %v840_v10  ;;  %v855_v14 = vshrl.u32 %v840_v10, 16 }
 0x171   : > { %v925_v15 = vcombine.high %v849_v5, %v2764_v41  ;;  %v2787_v16 = vrot.slane %v849_v5, %v2766_v45  ;;  %v611_v17 = vrot.slane %v597_v7, %v2766_v45  ;;  %v612_v18 = vcombine.low %v589_v56, %v604_v8 }
 0x172   : > { %v613_v19 = vcombine.high %v589_v56, %v604_v8  ;;  %v663_v20 = vcombine.high %v574_v6, %v2764_v41  ;;  %v670_v21 = vrot.slane %v574_v6, %v2766_v45  ;;  %v857_v22 = vpack.i.b16 %v856_v12, %v855_v14 }
 0x173   : > { %v2793_v23 = vrot.slane %v925_v15, %v2766_v45  ;;  %v620_v24 = vrot.slane %v612_v18, %v2769_v51  ;;  %v628_v25 = vcombine.low %v596_v59, %v611_v17  ;;  %v629_v26 = vcombine.high %v596_v59, %v611_v17 }
 0x174   : > { %v627_v27 = vrot.slane %v613_v19, %v2769_v51  ;;  %v677_v28 = vrot.slane %v663_v20, %v2766_v45  ;;  %v678_v29 = vcombine.low %v655_v63, %v670_v21  ;;  %v679_v30 = vcombine.high %v655_v63, %v670_v21 }
 0x175   : > { %v636_v31 = vrot.slane %v628_v25, %v2769_v51  ;;  %v643_v32 = vrot.slane %v629_v26, %v2769_v51  ;;  %v874_v33 = vcombine.high %v853_v13, %v2764_v41  ;;  %v881_v34 = vrot.slane %v853_v13, %v2766_v45 }
 0x176   : > { %v686_v35 = vrot.slane %v678_v29, %v2769_v51  ;;  %v693_v36 = vrot.slane %v679_v30, %v2769_v51  ;;  %v694_v37 = vcombine.low %v662_v2, %v677_v28  ;;  %v695_v38 = vcombine.high %v662_v2, %v677_v28 }
 0x177   : > { %v714_v39 = vcombine.low %v620_v24, %v627_v27  ;;  %v2302_v40 = vcombine.high %v620_v24, %v627_v27  ;;  %v730_v42 = vcombine.low %v636_v31, %v643_v32  ;;  %v2303_v43 = vcombine.high %v636_v31, %v643_v32 }
 0x178   : > { %v702_v44 = vrot.slane %v694_v37, %v2769_v51  ;;  %v709_v46 = vrot.slane %v695_v38, %v2769_v51  ;;  %v764_v47 = vcombine.low %v686_v35, %v693_v36  ;;  %v2304_v48 = vcombine.high %v686_v35, %v693_v36 }
 0x179   : > { %v721_v49 = vrot.slane %v714_v39, %v2766_v45  ;;  %v729_v50 = vrot.slane %v2302_v40, %v2766_v45  ;;  %v737_v52 = vrot.slane %v730_v42, %v2766_v45  ;;  %v745_v53 = vrot.slane %v2303_v43, %v2766_v45 }
 0x17a   : > { %v771_v54 = vrot.slane %v764_v47, %v2766_v45  ;;  %v779_v55 = vrot.slane %v2304_v48, %v2766_v45  ;;  %v780_v56 = vcombine.low %v702_v44, %v709_v46  ;;  %v2305_v57 = vcombine.high %v702_v44, %v709_v46 }
 0x17b   : > { %v746_v58 = vcombine.low %v721_v49, %v729_v50  ;;  %v754_v59 = vcombine.low %v737_v52, %v745_v53  ;;  %v888_v60 = vrot.slane %v874_v33, %v2766_v45  ;;  %v889_v61 = vcombine.low %v2778_v4, %v881_v34 }
 0x17c   : > { %v787_v62 = vrot.slane %v780_v56, %v2766_v45  ;;  %v795_v63 = vrot.slane %v2305_v57, %v2766_v45  ;;  %v796_v2 = vcombine.low %v771_v54, %v779_v55  ;;  %v890_v3 = vcombine.high %v2778_v4, %v881_v34 }
 0x17d   : > { %v753_v5 = vrot.slane %v746_v58, %v2769_v51  ;;  %v761_v6 = vrot.slane %v754_v59, %v2769_v51  ;;  %v897_v7 = vrot.slane %v889_v61, %v2769_v51  ;;  %v905_v8 = vcombine.low %v2783_v11, %v888_v60 }
 0x17e   : > { %v803_v9 = vrot.slane %v796_v2, %v2769_v51  ;;  %v804_v10 = vcombine.low %v787_v62, %v795_v63  ;;  %v904_v12 = vrot.slane %v890_v3, %v2769_v51  ;;  %v906_v13 = vcombine.high %v2783_v11, %v888_v60 }
 0x17f   : > { %v762_v14 = vcombine.low %v753_v5, %v761_v6  ;;  %v763_v15 = vcombine.high %v753_v5, %v761_v6  ;;  %v913_v17 = vrot.slane %v905_v8, %v2769_v51  ;;  %v940_v4 = vcombine.high %v857_v22, %v2764_v41 }
 0x180   : > { %v811_v18 = vrot.slane %v804_v10, %v2769_v51  ;;  %v920_v19 = vrot.slane %v906_v13, %v2769_v51  ;;  %v947_v20 = vrot.slane %v857_v22, %v2766_v45  ;;  %v991_v21 = vcombine.low %v897_v7, %v904_v12 }
 0x181   : > { %v818_v24 = vshrl.u32 %v762_v14, 16  ;;  %v826_v25 = vshrl.u32 %v763_v15, 16  ;;  %v954_v26 = vrot.slane %v940_v4, %v2766_v45  ;;  %v2306_v27 = vcombine.high %v897_v7, %v904_v12 }
 0x182   : > { %v812_v28 = vcombine.low %v803_v9, %v811_v18  ;;  %v813_v11 = vcombine.high %v803_v9, %v811_v18  ;;  %v955_v29 = vcombine.low %v2787_v16, %v947_v20  ;;  %v956_v30 = vcombine.high %v2787_v16, %v947_v20 }
 0x183   : > { %v971_v41 = vcombine.low %v2793_v23, %v954_v26  ;;  %v972_v31 = vcombine.high %v2793_v23, %v954_v26  ;;  %v998_v32 = vrot.slane %v991_v21, %v2766_v45  ;;  %v1006_v22 = vrot.slane %v2306_v27, %v2766_v45 }
 0x184   : > { %v816_v33 = vpack.i.b16 %v812_v28, %v762_v14  ;;  %v819_v34 = vshrl.u32 %v812_v28, 16  ;;  %v824_v35 = vpack.i.b16 %v813_v11, %v763_v15  ;;  %v827_v36 = vshrl.u32 %v813_v11, 16 }
 0x185   : > { %v963_v37 = vrot.slane %v955_v29, %v2769_v51  ;;  %v970_v38 = vrot.slane %v956_v30, %v2769_v51  ;;  %v979_v39 = vrot.slane %v971_v41, %v2769_v51  ;;  %v986_v16 = vrot.slane %v972_v31, %v2769_v51 }
 0x186   : > { %v820_v40 = vpack.i.b16 %v819_v34, %v818_v24  ;;  %v828_v42 = vpack.i.b16 %v827_v36, %v826_v25  ;;  %831 = vst.msk [vmem:[#allocation2] sm:$0xff] %vm830_vm2, %v816_v33  ;;  %833 = vst.msk [vmem:[#allocation2 + $0x10] sm:$0xff] %vm830_vm2, %v824_v35  ;;  %v1007_v23 = vcombine.low %v913_v17, %v920_v19 }
 0x187   : > { %v2307_v43 = vcombine.high %v913_v17, %v920_v19  ;;  %v1041_v44 = vcombine.low %v963_v37, %v970_v38  ;;  %v2308_v46 = vcombine.high %v963_v37, %v970_v38  ;;  %v1057_v47 = vcombine.low %v979_v39, %v986_v16 }
 0x188   : > { %832 = vst.msk [vmem:[#allocation2 + $0x8] sm:$0xff] %vm830_vm2, %v820_v40  ;;  %834 = vst.msk [vmem:[#allocation2 + $0x18] sm:$0xff] %vm830_vm2, %v828_v42  ;;  %v1014_v48 = vrot.slane %v1007_v23, %v2766_v45  ;;  %v1023_v50 = vcombine.low %v998_v32, %v1006_v22  ;;  %v2309_v52 = vcombine.high %v979_v39, %v986_v16 }
 0x189   : > { %v1022_v49 = vrot.slane %v2307_v43, %v2766_v45  ;;  %v1048_v53 = vrot.slane %v1041_v44, %v2766_v45  ;;  %v1056_v54 = vrot.slane %v2308_v46, %v2766_v45  ;;  %v1064_v55 = vrot.slane %v1057_v47, %v2766_v45 }
 0x18a   : > { %v1072_v57 = vrot.slane %v2309_v52, %v2766_v45  ;;  %v1030_v59 = vrot.slane %v1023_v50, %v2769_v51 }
 0x18b   : > { %v1031_v56 = vcombine.low %v1014_v48, %v1022_v49  ;;  %v1073_v58 = vcombine.low %v1048_v53, %v1056_v54 }
 0x18c   : > { %v1081_v61 = vcombine.low %v1064_v55, %v1072_v57 }
 0x18d   : > { %v1038_v60 = vrot.slane %v1031_v56, %v2769_v51  ;;  %v1080_v2 = vrot.slane %v1073_v58, %v2769_v51 }
 0x18e   : > { %v1088_v3 = vrot.slane %v1081_v61, %v2769_v51 }
 0x18f   : > { %v1039_v62 = vcombine.low %v1030_v59, %v1038_v60  ;;  %v1040_v63 = vcombine.high %v1030_v59, %v1038_v60 }
 0x190   : > { %v1089_v5 = vcombine.low %v1080_v2, %v1088_v3  ;;  %v1090_v6 = vcombine.high %v1080_v2, %v1088_v3 }
 0x191   : > { %v1095_v7 = vshrl.u32 %v1039_v62, 16  ;;  %v1103_v8 = vshrl.u32 %v1040_v63, 16 }
 0x192   : > { %v1093_v9 = vpack.i.b16 %v1089_v5, %v1039_v62  ;;  %v1096_v10 = vshrl.u32 %v1089_v5, 16  ;;  %v1101_v12 = vpack.i.b16 %v1090_v6, %v1040_v63  ;;  %v1104_v45 = vshrl.u32 %v1090_v6, 16 }
 0x194   : > { %v1097_v13 = vpack.i.b16 %v1096_v10, %v1095_v7  ;;  %v1105_v14 = vpack.i.b16 %v1104_v45, %v1103_v8  ;;  %1107 = vst.msk [vmem:[#allocation3] sm:$0xff] %vm830_vm2, %v1093_v9  ;;  %1109 = vst.msk [vmem:[#allocation3 + $0x10] sm:$0xff] %vm830_vm2, %v1101_v12 }
 0x196   : > { %1108 = vst.msk [vmem:[#allocation3 + $0x8] sm:$0xff] %vm830_vm2, %v1097_v13  ;;  %1110 = vst.msk [vmem:[#allocation3 + $0x18] sm:$0xff] %vm830_vm2, %v1105_v14 }
 0x197 PF: > { %v2542_v51 = vld [vmem:[%s3038_s2] sm:$0xff]   ;;  %v2620_v15 = vmov 0.0   ;;  %v2543_v17 = vld [vmem:[%s3038_s2 + $0x8] sm:$0xff]   ;;  %vm2621_vm3 = vmmov 0   ;;  %s2310_s26 = sshll.u32 %s2594_s13, 3  ;;  %vm1141_vm4 = vcmask 261120   ;;  %v1125_v20 = vlaneseq }
 0x198   : > { %2395 = vmatprep.subr.bf16.mxu0 %v2620_v15  ;;  %2403 = vmatprep.subr.bf16.mxu1 %v2620_v15  ;;  %s1112_s30 = sshra.s32 %s2310_s26, 3  ;;  %s2622_s13 = smov 104   ;;  %v1354_v41 = vld [vmem:[#allocation2] sm:$0xff]  ;;  %vm1358_vm5 = vcmask 64512   ;;  %v1355_v31 = vld [vmem:[#allocation2 + $0x8] sm:$0xff]  ;;  %v2627_v55 = vmov 0  }
 0x199   : > { %2396 = vmatpush3.bf16.msra.mxu0 %v2542_v51  ;;  %2399 = vmatprep.mubr.msk.bf16.mxu0 %vm2621_vm3, %v2620_v15  ;;  %s2311_s11 = sshll.u32 %s1112_s30, 2  ;;  %v2881_v21 = vshrl.u32 %v1125_v20, 7  ;;  %v1363_v32 = vsel %vm1358_vm5, %v1354_v41, 0  ;;  %v1409_v22 = vsel %vm1358_vm5, %v1355_v31, 0  ;;  %v2625_v33 = vmov 1983009808  }
 0x19a   : > { %2397 = vmatprep.subr.bf16.mxu0 %v2620_v15  ;;  %2405 = vmatprep.mubr.msk.bf16.mxu1 %vm2621_vm3, %v2620_v15  ;;  %s1115_s20 = scalar_lea.vmem %s2733_s29, %s2311_s11  ;;  %s1118_s21 = scalar_lea.vmem %s2738_s12, %s2311_s11  ;;  %v1194_v34 = vunpack.c.l.s4 %v2625_v33  ;;  %v2626_v35 = vmov 1934713408   ;;  %v1356_v41 = vld [vmem:[#allocation2 + $0x10] sm:$0xff]  ;;  %vm1543_vm6 = vcmask 130048   ;;  %vm1918_vm7 = vcmask 195584  }
 0x19b   : > { %v2874_v4 = vld [vmem:[%s1115_s20] sm:$0xf]  ;;  %v1127_v24 = vsub.s32 0, %v2881_v21  ;;  %s2623_s29 = smov 120   ;;  %s2624_s12 = smov 112   ;;  %2404 = vmatpush3.bf16.xpose.msra.mxu1 %v1363_v32  ;;  %v1211_v36 = vunpack.c.l.s4 %v2626_v35  ;;  %v1357_v32 = vld [vmem:[#allocation2 + $0x18] sm:$0xff] }
 0x19c   : > { %v1119_v18 = vld [vmem:[%s1118_s21] sm:$0xf]  ;;  %2415 = vmatprep.subr.bf16.mxu1 %v2620_v15  ;;  %v1195_v37 = vunpack.c.0.s8 %v1194_v34  ;;  %v1455_v33 = vsel %vm1358_vm5, %v1356_v41, 0  ;;  %s2628_s24 = smov 16   ;;  %s2629_s25 = smov 8   ;;  %vm2115_vm8 = vcmask 523264  }
 0x19d   : > { %2398 = vmatpush3.bf16.msra.mxu0 %v2543_v17  ;;  %v1120_v19 = vadd.bf16 %v1119_v18, %v2874_v4  ;;  %v1128_v25 = vrot.slane %v2722_v0, %v1127_v24  ;;  %v1212_v38 = vunpack.c.0.s8 %v1211_v36  ;;  %s2630_s26 = smov 24   ;;  %vm2184_vm9 = vcmask 257024  }
 0x19e   : > { %2409 = vmatprep.subr.bf16.mxu0 %v2620_v15  ;;  %v2890_v39 = vsub.s32 %v1195_v37, %v2881_v21  ;;  %v1501_v37 = vsel %vm1358_vm5, %v1357_v32, 0 }
 0x19f   : > { %v2893_v42 = vsub.s32 %v1212_v38, %v2881_v21 }
 0x1a0   : > { %2400 = vmatmul.mubr.msk.bf16.vlgmr.msra.gmra.mrb[0].mxu0 %vm1141_vm4, %v1120_v19 }
 0x1a1   : > { %2411 = vmatprep.mubr.msk.bf16.mxu0 %vm2621_vm3, %v2620_v15 }
 0x1a6   : > { %2410 = vmatpush3.bf16.xpose.msra.mxu0 %v1409_v22 }
 0x1a7   : > { %2421 = vmatprep.subr.bf16.mxu0 %v2620_v15 }
 0x273   : > { %v1179_v26 = vpop.f32.mrb[0].mxu0 }
 0x274   : > { %v1180_v27 = vadd.f32 %v1179_v26, %v1128_v25  ;;  %v2401_v28 = vpop.f32.mrb[1].mxu0 }
 0x275   : > { %v1182_v11 = vpop.f32.mrb[2].mxu0 }
 0x276   : > { %v1185_v29 = vpack.c.bf16 %v1180_v27, %v1180_v27  ;;  %v2402_v30 = vpop.f32.mrb[3].mxu0 }
 0x278   : > { %1191 = vrot.lane.b32.xlu1 %v1185_v29, %s2622_s13  ;;  %1187 = vrot.lane.b32.xlu0 %v1185_v29, %s2623_s29  ;;  %v1199_v50 = vrot.slane %v1185_v29, %v2890_v39 }
 0x27c   : > { %1189 = vrot.lane.b32.xlu0 %v1185_v29, %s2624_s12 }
 0x2ea   : > { %v1192_v16 = vpop.permute.xlu1 %1191  ;;  %v1188_v40 = vpop.permute.xlu0 %1187 }
 0x2eb   : > { %v1241_v23 = vrot.slane %v1192_v16, %v2890_v39  ;;  %v1233_v43 = vrot.slane %v1188_v40, %v2890_v39 }
 0x2ed   : > { %v1242_v44 = vcombine.low %v1233_v43, %v1241_v23  ;;  %v1243_v46 = vcombine.high %v1233_v43, %v1241_v23 }
 0x2ee   : > { %v1190_v47 = vpop.permute.xlu0 %1189 }
 0x2ef   : > { %v1250_v48 = vrot.slane %v1242_v44, %v2893_v42  ;;  %v1207_v49 = vrot.slane %v1190_v47, %v2890_v39  ;;  %v1257_v52 = vrot.slane %v1243_v46, %v2893_v42 }
 0x2f1   : > { %v1208_v53 = vcombine.low %v1199_v50, %v1207_v49  ;;  %v1209_v54 = vcombine.high %v1199_v50, %v1207_v49  ;;  %v1258_v56 = vcombine.high %v1250_v48, %v2627_v55  ;;  %v1259_v59 = vcombine.high %v1257_v52, %v2627_v55 }
 0x2f2   : > { %v1265_v60 = vshrl.u32 %v1250_v48, 16  ;;  %v1281_v5 = vshrl.u32 %v1257_v52, 16 }
 0x2f3   : > { %v1216_v57 = vrot.slane %v1208_v53, %v2893_v42  ;;  %v1223_v58 = vrot.slane %v1209_v54, %v2893_v42  ;;  %v1273_v3 = vshrl.u32 %v1258_v56, 16  ;;  %v1289_v45 = vshrl.u32 %v1259_v59, 16 }
 0x2f5   : > { %v1224_v61 = vcombine.high %v1216_v57, %v2627_v55  ;;  %v1225_v62 = vcombine.high %v1223_v58, %v2627_v55  ;;  %v1262_v63 = vpack.i.b16 %v1250_v48, %v1216_v57  ;;  %v1264_v2 = vshrl.u32 %v1216_v57, 16 }
 0x2f6   : > { %v1278_v6 = vpack.i.b16 %v1257_v52, %v1223_v58  ;;  %v1280_v7 = vshrl.u32 %v1223_v58, 16 }
 0x2f7   : > { %v1266_v8 = vpack.i.b16 %v1265_v60, %v1264_v2  ;;  %v1270_v9 = vpack.i.b16 %v1258_v56, %v1224_v61  ;;  %v1272_v10 = vshrl.u32 %v1224_v61, 16  ;;  %v1286_v12 = vpack.i.b16 %v1259_v59, %v1225_v62 }
 0x2f8   : > { %v1282_v13 = vpack.i.b16 %v1281_v5, %v1280_v7  ;;  %v1288_v14 = vshrl.u32 %v1225_v62, 16  ;;  %v1292_v51 = vcombine.low %v1262_v63, %v1278_v6 }
 0x2f9   : > { %v1274_v17 = vpack.i.b16 %v1273_v3, %v1272_v10  ;;  %v1300_v18 = vcombine.low %v1270_v9, %v1286_v12 }
 0x2fa   : > { %v1290_v19 = vpack.i.b16 %v1289_v45, %v1288_v14  ;;  %v1317_v20 = vcombine.low %v1266_v8, %v1282_v13  ;;  %v1299_v24 = vrot.slane %v1292_v51, %v2890_v39 }
 0x2fb   : > { %v1307_v25 = vrot.slane %v1300_v18, %v2890_v39 }
 0x2fc   : > { %v1325_v26 = vcombine.low %v1274_v17, %v1290_v19  ;;  %v1324_v28 = vrot.slane %v1317_v20, %v2890_v39 }
 0x2fd   : > { %v1308_v27 = vcombine.low %v1299_v24, %v1307_v25 }
 0x2fe   : > { %v1332_v11 = vrot.slane %v1325_v26, %v2890_v39 }
 0x2ff   : > { %v1315_v29 = vrot.slane %v1308_v27, %v2893_v42 }
 0x300   : > { %v1333_v30 = vcombine.low %v1324_v28, %v1332_v11 }
 0x301   : > { %v1345_v34 = vshrl.u32 %v1315_v29, 16  ;;  %v1316_v16 = vcombine.high %v1315_v29, %v2627_v55 }
 0x302   : > { %v1340_v31 = vrot.slane %v1333_v30, %v2893_v42  ;;  %v1593_v30 = vld [vmem:[#allocation3 + $0x8] sm:$0xff] }
 0x303   : > { %v1351_v43 = vshrl.u32 %v1316_v16, 16 }
 0x304   : > { %v1344_v22 = vpack.i.b16 %v1340_v31, %v1315_v29  ;;  %v1346_v35 = vshrl.u32 %v1340_v31, 16  ;;  %v1341_v38 = vcombine.high %v1340_v31, %v2627_v55  ;;  %v1592_v29 = vld [vmem:[#allocation3] sm:$0xff] }
 0x306   : > { %2406 = vmatmul.mubr.msk.bf16.vlgmr.msra.gmra.mrb[0].mxu1 %vm1358_vm5, %v1344_v22  ;;  %v1347_v36 = vpack.i.b16 %v1346_v35, %v1345_v34  ;;  %v1352_v40 = vshrl.u32 %v1341_v38, 16  ;;  %v1350_v23 = vpack.i.b16 %v1341_v38, %v1316_v16  ;;  %v1594_v38 = vld [vmem:[#allocation3 + $0x10] sm:$0xff] }
 0x307   : > { %2416 = vmatpush3.bf16.xpose.msra.mxu1 %v1455_v33  ;;  %2417 = vmatprep.mubr.msk.bf16.mxu1 %vm2621_vm3, %v2620_v15 }
 0x308   : > { %2412 = vmatmul.mubr.msk.bf16.vlgmr.msra.gmra.mrb[4].mxu0 %vm1358_vm5, %v1347_v36  ;;  %2427 = vmatprep.subr.bf16.mxu1 %v2620_v15  ;;  %v1353_v44 = vpack.i.b16 %v1352_v40, %v1351_v43  ;;  %v1595_v40 = vld [vmem:[#allocation3 + $0x18] sm:$0xff] }
 0x309   : > { %2422 = vmatpush3.bf16.xpose.msra.mxu0 %v1501_v37  ;;  %2423 = vmatprep.mubr.msk.bf16.mxu0 %vm2621_vm3, %v2620_v15 }
 0x30a   : > { %2433 = vmatprep.subr.bf16.mxu0 %v2620_v15 }
 0x30e   : > { %2418 = vmatmul.mubr.msk.bf16.vlgmr.msra.gmra.mrb[4].mxu1 %vm1358_vm5, %v1350_v23 }
 0x30f   : > { %2429 = vmatprep.mubr.msk.bf16.mxu1 %vm2621_vm3, %v2620_v15  ;;  %2428 = vmatpush3.bf16.msra.mxu1 %v1592_v29 }
 0x310   : > { %2424 = vmatmul.mubr.msk.bf16.vlgmr.msra.gmra.mrb[8].mxu0 %vm1358_vm5, %v1353_v44  ;;  %2439 = vmatprep.subr.bf16.mxu1 %v2620_v15 }
 0x311   : > { %2435 = vmatprep.mubr.msk.bf16.mxu0 %vm2621_vm3, %v2620_v15  ;;  %2434 = vmatpush3.bf16.msra.mxu0 %v1593_v30 }
 0x312   : > { %2445 = vmatprep.subr.bf16.mxu0 %v2620_v15 }
 0x3d9   : > { %v1399_v46 = vpop.f32.mrb[0].mxu1 }
 0x3da   : > { %v2407_v47 = vpop.f32.mrb[1].mxu1  ;;  %v1544_v48 = vsel %vm1543_vm6, %v1399_v46, -inf }
 0x3db   : > { %1545 = vmax.xlane.f32.xlu1 %v1544_v48  ;;  %v1402_v49 = vpop.f32.mrb[2].mxu1  ;;  %v1445_v50 = vpop.f32.mrb[4].mxu0 }
 0x3dc   : > { %v2408_v52 = vpop.f32.mrb[3].mxu1  ;;  %v2413_v53 = vpop.f32.mrb[5].mxu0  ;;  %v1547_v54 = vsel %vm1543_vm6, %v1445_v50, -inf  ;;  %v2544_v49 = vld [vmem:[%s3041_s5] sm:$0xff]  }
 0x3dd   : > { %1548 = vmax.xlane.f32.xlu0 %v1547_v54  ;;  %v1448_v55 = vpop.f32.mrb[6].mxu0 }
 0x3de   : > { %v2414_v56 = vpop.f32.mrb[7].mxu0 }
 0x3e1   : > { %v1491_v57 = vpop.f32.mrb[4].mxu1 }
 0x3e2   : > { %v2419_v58 = vpop.f32.mrb[5].mxu1  ;;  %v1550_v59 = vsel %vm1543_vm6, %v1491_v57, -inf }
 0x3e3   : > { %v1494_v60 = vpop.f32.mrb[6].mxu1  ;;  %1551 = vmax.xlane.f32.xlu0 %v1550_v59  ;;  %v1537_v61 = vpop.f32.mrb[8].mxu0 }
 0x3e4   : > { %v2420_v62 = vpop.f32.mrb[7].mxu1  ;;  %v2425_v63 = vpop.f32.mrb[9].mxu0  ;;  %v1553_v2 = vsel %vm1543_vm6, %v1537_v61, -inf }
 0x3e5   : > { %1554 = vmax.xlane.f32.xlu1 %v1553_v2  ;;  %v1540_v3 = vpop.f32.mrb[10].mxu0 }
 0x3e6   : > { %v2426_v5 = vpop.f32.mrb[11].mxu0 }
 0x468   : > { %v1546_v6 = vpop.xlane.xlu1 %1545 }
 0x469   : > { %v1556_v7 = vsub.f32 %v1399_v46, %v1546_v6 }
 0x46a   : > { %v1549_v8 = vpop.xlane.xlu0 %1548 }
 0x46b   : > { %v1560_v9 = vmul.f32 1.442695, %v1556_v7  ;;  %v1557_v10 = vsub.f32 %v1445_v50, %v1549_v8 }
 0x46d   : > { %2552 = vpow2.f32 %v1560_v9  ;;  %v1562_v12 = vmul.f32 1.442695, %v1557_v10 }
 0x46f   : > { %2554 = vpow2.f32 %v1562_v12 }
 0x470   : > { %v1552_v45 = vpop.xlane.xlu0 %1551 }
 0x471   : > { %v1558_v13 = vsub.f32 %v1491_v57, %v1552_v45 }
 0x472   : > { %v1555_v14 = vpop.xlane.xlu1 %1554 }
 0x473   : > { %v1564_v51 = vmul.f32 1.442695, %v1558_v13  ;;  %v1559_v17 = vsub.f32 %v1537_v61, %v1555_v14 }
 0x475   : > { %2556 = vpow2.f32 %v1564_v51  ;;  %v1566_v18 = vmul.f32 1.442695, %v1559_v17 }
 0x477   : > { %v2553_v19 = vpop.eup %2552  ;;  %2558 = vpow2.f32 %v1566_v18 }
 0x478   : > { %v1568_v20 = vsel %vm1543_vm6, %v2553_v19, 0.0 }
 0x479   : > { %v2555_v24 = vpop.eup %2554  ;;  %1569 = vadd.xlane.f32.xlu0 %v1568_v20 }
 0x47a   : > { %v1571_v25 = vsel %vm1543_vm6, %v2555_v24, 0.0 }
 0x47b   : > { %1572 = vadd.xlane.f32.xlu1 %v1571_v25 }
 0x47f   : > { %v2557_v26 = vpop.eup %2556 }
 0x480   : > { %v1574_v27 = vsel %vm1543_vm6, %v2557_v26, 0.0 }
 0x481   : > { %v2559_v28 = vpop.eup %2558  ;;  %1575 = vadd.xlane.f32.xlu0 %v1574_v27 }
 0x482   : > { %v1577_v11 = vsel %vm1543_vm6, %v2559_v28, 0.0 }
 0x483   : > { %1578 = vadd.xlane.f32.xlu1 %v1577_v11 }
 0x506   : > { %v1570_v41 = vpop.xlane.xlu0 %1569 }
 0x507   : > { %2560 = vrcp.f32 %v1570_v41 }
 0x508   : > { %v1573_v31 = vpop.xlane.xlu1 %1572 }
 0x509   : > { %2562 = vrcp.f32 %v1573_v31 }
 0x50e   : > { %v1576_v32 = vpop.xlane.xlu0 %1575 }
 0x50f   : > { %2564 = vrcp.f32 %v1576_v32 }
 0x510   : > { %v1579_v22 = vpop.xlane.xlu1 %1578 }
 0x511   : > { %v2561_v33 = vpop.eup %2560  ;;  %2566 = vrcp.f32 %v1579_v22 }
 0x512   : > { %v1584_v34 = vmul.f32 %v2561_v33, %v2553_v19  ;;  %v2545_v19 = vld [vmem:[%s3041_s5 + $0x8] sm:$0xff]  }
 0x513   : > { %v2563_v35 = vpop.eup %2562 }
 0x514   : > { %v1585_v36 = vmul.f32 %v2563_v35, %v2555_v24  ;;  %v1588_v37 = vpack.c.bf16 %v1584_v34, %v1584_v34 }
 0x516   : > { %2430 = vmatmul.mubr.msk.bf16.vlgmr.msra.gmra.mrb[8].mxu1 %vm1543_vm6, %v1588_v37  ;;  %v1589_v16 = vpack.c.bf16 %v1585_v36, %v1585_v36 }
 0x517   : > { %2440 = vmatpush3.bf16.msra.mxu1 %v1594_v38  ;;  %2441 = vmatprep.mubr.msk.bf16.mxu1 %vm2621_vm3, %v2620_v15 }
 0x518   : > { %2436 = vmatmul.mubr.msk.bf16.vlgmr.msra.gmra.mrb[12].mxu0 %vm1543_vm6, %v1589_v16  ;;  %2451 = vmatprep.subr.bf16.mxu1 %v2620_v15 }
 0x519   : > { %v2565_v23 = vpop.eup %2564  ;;  %2446 = vmatpush3.bf16.msra.mxu0 %v1595_v40  ;;  %2447 = vmatprep.mubr.msk.bf16.mxu0 %vm2621_vm3, %v2620_v15 }
 0x51a   : > { %v1586_v43 = vmul.f32 %v2565_v23, %v2557_v26  ;;  %2459 = vmatprep.subr.bf16.mxu0 %v2620_v15 }
 0x51b   : > { %v2567_v44 = vpop.eup %2566 }
 0x51c   : > { %v1587_v46 = vmul.f32 %v2567_v44, %v2559_v28  ;;  %v1590_v47 = vpack.c.bf16 %v1586_v43, %v1586_v43 }
 0x51e   : > { %2442 = vmatmul.mubr.msk.bf16.vlgmr.msra.gmra.mrb[12].mxu1 %vm1543_vm6, %v1590_v47  ;;  %v1591_v48 = vpack.c.bf16 %v1587_v46, %v1587_v46 }
 0x51f   : > { %2455 = vmatprep.mubr.msk.bf16.mxu1 %vm2621_vm3, %v2620_v15  ;;  %2452 = vmatpush3.bf16.msra.mxu1 %v2544_v49 }
 0x520   : > { %2448 = vmatmul.mubr.msk.bf16.vlgmr.msra.gmra.mrb[16].mxu0 %vm1543_vm6, %v1591_v48  ;;  %2453 = vmatprep.subr.bf16.mxu1 %v2620_v15 }
 0x521   : > { %2463 = vmatprep.mubr.msk.bf16.mxu0 %vm2621_vm3, %v2620_v15 }
 0x523   : > { %2454 = vmatpush3.bf16.msra.mxu1 %v2545_v19 }
 0x524   : > { %2467 = vmatprep.subr.bf16.mxu1 %v2620_v15 }
 0x5e9   : > { %v1633_v50 = vpop.f32.mrb[8].mxu1 }
 0x5ea   : > { %v2431_v52 = vpop.f32.mrb[9].mxu1 }
 0x5eb   : > { %v1636_v53 = vpop.f32.mrb[10].mxu1  ;;  %v1676_v54 = vpop.f32.mrb[12].mxu0  ;;  %v1927_v52 = vsub.s32 3, %v2881_v21 }
 0x5ec   : > { %v2432_v55 = vpop.f32.mrb[11].mxu1  ;;  %v2437_v56 = vpop.f32.mrb[13].mxu0 }
 0x5ed   : > { %v1679_v57 = vpop.f32.mrb[14].mxu0  ;;  %v1928_v53 = vrot.slane %v2722_v0, %v1927_v52 }
 0x5ee   : > { %v2438_v58 = vpop.f32.mrb[15].mxu0 }
 0x5f1   : > { %v1719_v59 = vpop.f32.mrb[12].mxu1 }
 0x5f2   : > { %v1768_v60 = vcombine.low %v1633_v50, %v1719_v59  ;;  %v1769_v61 = vcombine.high %v1633_v50, %v1719_v59  ;;  %v2443_v62 = vpop.f32.mrb[13].mxu1 }
 0x5f3   : > { %v1722_v63 = vpop.f32.mrb[14].mxu1  ;;  %v1762_v2 = vpop.f32.mrb[16].mxu0 }
 0x5f4   : > { %v1784_v3 = vcombine.low %v1676_v54, %v1762_v2  ;;  %v1785_v5 = vcombine.high %v1676_v54, %v1762_v2  ;;  %v2444_v6 = vpop.f32.mrb[15].mxu1  ;;  %v2449_v7 = vpop.f32.mrb[17].mxu0  ;;  %v1776_v9 = vrot.slane %v1768_v60, %v2890_v39  ;;  %v1783_v10 = vrot.slane %v1769_v61, %v2890_v39 }
 0x5f5   : > { %v1765_v8 = vpop.f32.mrb[18].mxu0  ;;  %v1984_v54 = vunpack.c.l.bf16 %v2874_v4  ;;  %v2546_v4 = vld [vmem:[%s3042_s6] sm:$0xff]   ;;  %v2547_v6 = vld [vmem:[%s3042_s6 + $0x8] sm:$0xff]  }
 0x5f6   : > { %v1792_v12 = vrot.slane %v1784_v3, %v2890_v39  ;;  %v1799_v45 = vrot.slane %v1785_v5, %v2890_v39  ;;  %v2450_v13 = vpop.f32.mrb[19].mxu0  ;;  %2460 = vmatpush3.bf16.msra.mxu0 %v2546_v4  ;;  %v2548_v7 = vld [vmem:[%s3043_s7] sm:$0xff]   ;;  %v2549_v8 = vld [vmem:[%s3043_s7 + $0x8] sm:$0xff]  }
 0x5f7   : > { %2461 = vmatprep.subr.bf16.mxu0 %v2620_v15  ;;  %v2007_v13 = vsub.s32 6, %v2881_v21 }
 0x5f8   : > { %v1800_v14 = vcombine.low %v1776_v9, %v1792_v12  ;;  %v1801_v51 = vcombine.high %v1776_v9, %v1792_v12  ;;  %v1816_v17 = vcombine.low %v1783_v10, %v1799_v45  ;;  %v1817_v18 = vcombine.high %v1783_v10, %v1799_v45 }
 0x5f9   : > { %v2002_v45 = vsub.s32 5, %v2881_v21 }
 0x5fa   : > { %v1808_v20 = vrot.slane %v1800_v14, %v2893_v42  ;;  %v1815_v24 = vrot.slane %v1801_v51, %v2893_v42  ;;  %v1824_v25 = vrot.slane %v1816_v17, %v2893_v42  ;;  %v1831_v26 = vrot.slane %v1817_v18, %v2893_v42  ;;  %2462 = vmatpush3.bf16.msra.mxu0 %v2547_v6 }
 0x5fb   : > { %v2003_v14 = vrot.slane %v2722_v0, %v2002_v45  ;;  %v2008_v18 = vrot.slane %v2722_v0, %v2007_v13 }
 0x5fc   : > { %v1836_v27 = vcombine.low %v1808_v20, %v1815_v24  ;;  %v2324_v28 = vcombine.high %v1808_v20, %v1815_v24  ;;  %v1852_v11 = vcombine.low %v1824_v25, %v1831_v26  ;;  %v2325_v29 = vcombine.high %v1824_v25, %v1831_v26  ;;  %v2550_v25 = vld [vmem:[%s3043_s7 + $0x10] sm:$0xff]   ;;  %v2551_v26 = vld [vmem:[%s3043_s7 + $0x18] sm:$0xff]  }
 0x5fe   : > { %v1843_v30 = vrot.slane %v1836_v27, %v2890_v39  ;;  %v1851_v41 = vrot.slane %v2324_v28, %v2890_v39  ;;  %v1859_v31 = vrot.slane %v1852_v11, %v2890_v39  ;;  %v1867_v32 = vrot.slane %v2325_v29, %v2890_v39  ;;  %v2329_v27 = vld [vmem:[%s3045_s9] ss:$0 sm:$0xff] }
 0x600   : > { %v1869_v22 = vcombine.high %v1843_v30, %v1851_v41  ;;  %v1885_v33 = vcombine.high %v1859_v31, %v1867_v32  ;;  %v1868_v34 = vcombine.low %v1843_v30, %v1851_v41  ;;  %v1884_v35 = vcombine.low %v1859_v31, %v1867_v32 }
 0x602   : > { %v1883_v36 = vrot.slane %v1869_v22, %v2893_v42  ;;  %v1899_v37 = vrot.slane %v1885_v33, %v2893_v42  ;;  %v1876_v38 = vrot.slane %v1868_v34, %v2893_v42  ;;  %v1892_v16 = vrot.slane %v1884_v35, %v2893_v42 }
 0x604   : > { %v1902_v40 = vcombine.low %v1883_v36, %v1899_v37  ;;  %v1901_v23 = vcombine.high %v1876_v38, %v1892_v16  ;;  %v1903_v43 = vcombine.high %v1883_v36, %v1899_v37  ;;  %v1900_v44 = vcombine.low %v1876_v38, %v1892_v16 }
 0x606   : > { %1909 = vrot.lane.b32.xlu1 %v1902_v40, %s2628_s24  ;;  %1905 = vrot.lane.b32.xlu0 %v1901_v23, %s2629_s25 }
 0x60a   : > { %1913 = vrot.lane.b32.xlu1 %v1903_v43, %s2630_s26 }
 0x678   : > { %v1910_v39 = vpop.permute.xlu1 %1909  ;;  %v1906_v46 = vpop.permute.xlu0 %1905 }
 0x679   : > { %v1916_v47 = vsel %vm1358_vm5, %v1900_v44, %v1906_v46 }
 0x67a   : > { %v1917_v49 = vsel %vm1543_vm6, %v1916_v47, %v1910_v39 }
 0x67c   : > { %v1914_v48 = vpop.permute.xlu1 %1913 }
 0x67d   : > { %v1919_v50 = vsel %vm1918_vm7, %v1917_v49, %v1914_v48  ;;  %v2175_v49 = vsub.s32 7, %v2881_v21 }
 0x67e   : > { %v1920_v42 = vpack.c.bf16 %v1919_v50, %v1919_v50 }
 0x67f   : > { %v2176_v50 = vrot.slane %v2722_v0, %v2175_v49 }
 0x680   : > { %2456 = vmatmul.mubr.msk.bf16.vlgmr.msra.gmra.mrb[16].mxu1 %vm1141_vm4, %v1920_v42 }
 0x681   : > { %2475 = vmatprep.mubr.msk.bf16.mxu1 %vm2621_vm3, %v2620_v15  ;;  %2468 = vmatpush3.bf16.msra.mxu1 %v2548_v7 }
 0x682   : > { %2469 = vmatprep.subr.bf16.mxu1 %v2620_v15 }
 0x685   : > { %2470 = vmatpush3.bf16.msra.mxu1 %v2549_v8 }
 0x686   : > { %2471 = vmatprep.subr.bf16.mxu1 %v2620_v15 }
 0x689   : > { %2472 = vmatpush3.bf16.msra.mxu1 %v2550_v25 }
 0x68a   : > { %2473 = vmatprep.subr.bf16.mxu1 %v2620_v15  ;;  %v2089_v15 = vsub.s32 4, %v2881_v21 }
 0x68c   : > { %v2090_v22 = vrot.slane %v2722_v0, %v2089_v15 }
 0x68d   : > { %2474 = vmatpush3.bf16.msra.mxu1 %v2551_v26 }
 0x753   : > { %v1978_v55 = vpop.f32.mrb[16].mxu1 }
 0x754   : > { %v1979_v56 = vadd.f32 %v1978_v55, %v1928_v53  ;;  %v2457_v57 = vpop.f32.mrb[17].mxu1 }
 0x755   : > { %v1981_v58 = vpop.f32.mrb[18].mxu1 }
 0x756   : > { %v2458_v59 = vpop.f32.mrb[19].mxu1  ;;  %v1985_v60 = vadd.f32 %v1984_v54, %v1979_v56 }
 0x758   : > { %v1986_v61 = vsel %vm1141_vm4, %v1985_v60, 0.0 }
 0x759   : > { %1987 = vadd.xlane.f32.xlu0 %v1986_v61 }
 0x7e6   : > { %v1988_v62 = vpop.xlane.xlu0 %1987 }
 0x7e7   : > { %v1990_v63 = vmul.f32 0.03125, %v1988_v62 }
 0x7e9   : > { %v1991_v2 = vsub.f32 %v1985_v60, %v1990_v63 }
 0x7eb   : > { %v1992_v3 = vmul.f32 %v1991_v2, %v1991_v2 }
 0x7ed   : > { %v1993_v5 = vsel %vm1141_vm4, %v1992_v3, 0.0 }
 0x7ee   : > { %1994 = vadd.xlane.f32.xlu1 %v1993_v5 }
 0x87b   : > { %v1995_v9 = vpop.xlane.xlu1 %1994 }
 0x87c   : > { %v1996_v10 = vmul.f32 0.03125, %v1995_v9 }
 0x87e   : > { %v1997_v12 = vadd.f32 1e-05, %v1996_v10 }
 0x880   : > { %2568 = vrsqrt.f32 %v1997_v12 }
 0x88a   : > { %v2569_v51 = vpop.eup %2568 }
 0x88b   : > { %v1999_v17 = vmul.f32 %v2569_v51, %v1991_v2 }
 0x88d   : > { %v2004_v19 = vmul.f32 %v2003_v14, %v1999_v17 }
 0x88f   : > { %v2009_v20 = vadd.f32 %v2008_v18, %v2004_v19 }
 0x891   : > { %v2010_v24 = vpack.c.bf16 %v2009_v20, %v2009_v20 }
 0x893   : > { %2464 = vmatmul.mubr.msk.bf16.vlgmr.msra.gmra.mrb[20].mxu0 %vm1141_vm4, %v2010_v24 }
 0x966   : > { %v2071_v28 = vpop.f32.mrb[20].mxu0 }
 0x967   : > { %v2072_v11 = vadd.f32 %v2329_v27, %v2071_v28  ;;  %v2465_v29 = vpop.f32.mrb[21].mxu0 }
 0x968   : > { %v2074_v30 = vpop.f32.mrb[22].mxu0 }
 0x969   : > { %v2077_v41 = vmax.f32 %v2072_v11, 0.0  ;;  %v2466_v31 = vpop.f32.mrb[23].mxu0 }
 0x96b   : > { %v2078_v32 = vpack.c.bf16 %v2077_v41, %v2077_v41 }
 0x96d   : > { %2476 = vmatmul.mubr.msk.bf16.vlgmr.msra.gmra.mrb[20].mxu1 %vm2115_vm8, %v2078_v32 }
 0xa40   : > { %v2153_v33 = vpop.f32.mrb[20].mxu1 }
 0xa41   : > { %v2154_v34 = vadd.f32 %v2153_v33, %v2090_v22  ;;  %v2477_v35 = vpop.f32.mrb[21].mxu1 }
 0xa42   : > { %v2156_v36 = vpop.f32.mrb[22].mxu1 }
 0xa43   : > { %v2478_v37 = vpop.f32.mrb[23].mxu1  ;;  %v2159_v38 = vadd.f32 %v2154_v34, %v2009_v20 }
 0xa45   : > { %v2160_v16 = vsel %vm1141_vm4, %v2159_v38, 0.0 }
 0xa46   : > { %2161 = vadd.xlane.f32.xlu0 %v2160_v16 }
 0xad3   : > { %v2162_v40 = vpop.xlane.xlu0 %2161 }
 0xad4   : > { %v2163_v23 = vmul.f32 0.03125, %v2162_v40 }
 0xad6   : > { %v2164_v43 = vsub.f32 %v2159_v38, %v2163_v23 }
 0xad8   : > { %v2165_v44 = vmul.f32 %v2164_v43, %v2164_v43 }
 0xada   : > { %v2166_v39 = vsel %vm1141_vm4, %v2165_v44, 0.0 }
 0xadb   : > { %2167 = vadd.xlane.f32.xlu0 %v2166_v39 }
 0xb68   : > { %v2168_v46 = vpop.xlane.xlu0 %2167 }
 0xb69   : > { %v2169_v47 = vmul.f32 0.03125, %v2168_v46 }
 0xb6b   : > { %v2170_v48 = vadd.f32 1e-05, %v2169_v47 }
 0xb6d   : > { %2570 = vrsqrt.f32 %v2170_v48 }
 0xb77   : > { %v2571_v42 = vpop.eup %2570 }
 0xb78   : > { %v2172_v52 = vmul.f32 %v2571_v42, %v2164_v43 }
 0xb7a   : > { %v2177_v53 = vmul.f32 %v2176_v50, %v2172_v52 }
 0xb7c   : > { %v2182_v54 = vadd.f32 %v2727_v1, %v2177_v53 }
 0xb7e   : > { %v2183_v55 = vpack.c.bf16 %v2182_v54, %v2182_v54 }
 0xb80   : > { %2185 = vst.msk [vmem:[%s2747_s23] sm:$0xf] %vm2184_vm9, %v2183_v55 }
 0xb81 PF: > { %s20_s17 = sadd.s32 1, %s2610_s17   ;;  %s3047_s13 = smov %s2602_s15 }
 0xb82   : > { %p17_p8 = scmp.ge.s32.totalorder %s20_s17, 6   ;;  %s3048_s14 = smov %s2606_s16 }
 0xb83   : > { %s3049_s15 = smov %s3052_s18  ;;  %s3050_s16 = smov %s3056_s19 }
 0xb84   :  { %19 = sbr.rel (!%p17_p8) target bundleno = 3 (0x3), region = 99 }

</bundles_post_ra>
